<compile_context>
chip_gen: v7x
topology: tpu7x:2x2x1
jax: 0.10.0
libtpu: 0.0.40
codegen_flags: <defaults>
</compile_context>

<pallas_src>
import jax
import jax.numpy as jnp
from jax import lax
from jax.experimental import pallas as pl
from jax.experimental.pallas import tpu as pltpu

BN_EPS = 1e-5
_TAPS = [(di, dj) for di in (-1, 0, 1) for dj in (-1, 0, 1)]   # index 4 = center


# ------------------------------ fused kernel ------------------------------
def _make_gcwm_kernel(H, W, PL):
    def kernel(mb_ref, x_ref, wdw1_ref, w1_ref, b1_ref, wdw2_ref, w2_ref,
               b2_ref, w3_ref, o_ref):

        def dw3x3(t, w_ref):
            # t: (C, PL) f32; w_ref: (9, C, 1) f32, tap-major.
            mb = mb_ref[...]                         # (1, PL) packed validity bits
            acc = w_ref[4] * t                       # center tap: always valid, no roll
            for idx, (di, dj) in enumerate(_TAPS):
                if (di, dj) == (0, 0):
                    continue
                off = di * W + dj
                src = pltpu.roll(t, (-off) % PL, 1)
                valid = (mb & (1 << idx)) != 0       # (1, PL), short-lived per tap
                acc = acc + w_ref[idx] * jnp.where(valid, src, 0.0)
            return acc

        # stage 1: depthwise 3x3 -> grouped 1x1 (BN folded, bf16 MXU) + ReLU
        h = dw3x3(x_ref[...], wdw1_ref)
        h = jnp.maximum(
            jnp.dot(w1_ref[...], h.astype(jnp.bfloat16),
                    preferred_element_type=jnp.float32) + b1_ref[...], 0.0)
        # stage 2: depthwise 3x3 -> grouped 1x1 (BN folded, bf16 MXU) + ReLU
        h = dw3x3(h, wdw2_ref)
        h = jnp.maximum(
            jnp.dot(w2_ref[...], h.astype(jnp.bfloat16),
                    preferred_element_type=jnp.float32) + b2_ref[...], 0.0)
        # GCWConv (banded channel-mixing matrix, bf16 MXU) + ReLU, then the
        # residual add -- x is re-read from VMEM here, not held in vregs.
        y = jnp.maximum(
            jnp.dot(w3_ref[...], h.astype(jnp.bfloat16),
                    preferred_element_type=jnp.float32), 0.0)
        o_ref[...] = y + x_ref[...]

    return kernel


# --------------------------- host-side param prep ---------------------------
def _fold_pw_bn(w_pw, gamma, beta, mean, var):
    # groups=2 1x1 conv weight (Cout, Cin//2) -> BN-folded block-diagonal (Cout, Cin)
    Cout, half = w_pw.shape
    Cin = 2 * half
    a = gamma / jnp.sqrt(var + BN_EPS)
    b = beta - a * mean
    Wfull = jnp.zeros((Cout, Cin), jnp.float32)
    Wfull = Wfull.at[:Cout // 2, :half].set(w_pw[:Cout // 2])
    Wfull = Wfull.at[Cout // 2:, half:].set(w_pw[Cout // 2:])
    return (a[:, None] * Wfull).astype(jnp.float32), b.reshape(Cout, 1).astype(jnp.float32)


def _gcw_matrix(w3, Cin, dc):
    # Conv3d(1, 2, (dc,1,1), stride (2,1,1), pad (dc//2-1,0,0)) + view  as a
    # banded (2*dout, Cin) channel-mixing matrix.
    pd = dc // 2 - 1
    dout = (Cin + 2 * pd - dc) // 2 + 1
    oc = jnp.arange(2 * dout)
    g = oc // dout
    d = oc % dout
    k = jnp.arange(dc)
    src = 2 * d[:, None] + k[None, :] - pd                       # (2*dout, dc)
    valid = (src >= 0) & (src < Cin)
    onehot = (src[:, :, None] == jnp.arange(Cin)[None, None, :]) & valid[:, :, None]
    M = jnp.sum(jnp.where(onehot, w3[g][:, :, None], 0.0), axis=1)
    return M.astype(jnp.float32), 2 * dout


def _tap_mask_bits(H, W, Nb):
    # Packed per-position validity bits for the 9 depthwise taps; one image
    # layout repeated Nb times along the lane axis.  row/col are PER-IMAGE
    # (row = (p // W) % H, col = p % W) so lane rolls can never leak data
    # across image boundaries once masked.
    P = H * W
    pos = jnp.arange(Nb * P, dtype=jnp.int32)
    col = pos % W
    row = (pos // W) % H
    bits = jnp.zeros((Nb * P,), jnp.int32)
    for idx, (di, dj) in enumerate(_TAPS):
        ok = (row + di >= 0) & (row + di < H) & (col + dj >= 0) & (col + dj < W)
        bits = bits | (ok.astype(jnp.int32) << idx)
    return bits.reshape(1, Nb * P)


# ------------------------------- full forward -------------------------------
def gcwm_forward(x, params):
    N, C, H, W = x.shape
    P = H * W
    dc = params["w3"].shape[1]
    assert C % 2 == 0 and dc % 2 == 0 and dc >= 2

    # ---- parameter prep (tiny, done once) ----
    w_dw1 = params["w_dw1"].reshape(C, 9).T.reshape(9, C, 1).astype(jnp.float32)
    w_dw2 = params["w_dw2"].reshape(C, 9).T.reshape(9, C, 1).astype(jnp.float32)
    W1, b1 = _fold_pw_bn(params["w_pw1"], params["bn1_gamma"], params["bn1_beta"],
                         params["bn1_mean"], params["bn1_var"])
    W2, b2 = _fold_pw_bn(params["w_pw2"], params["bn2_gamma"], params["bn2_beta"],
                         params["bn2_mean"], params["bn2_var"])
    Cout = W2.shape[0]
    W3m, C_gcw = _gcw_matrix(params["w3"], Cout, dc)
    assert C_gcw == C, "residual add requires GCWConv output channels == in_channels"
    # MXU operands in bf16 (f32 accumulation in-kernel); VPU path stays f32.
    W1b, W2b, W3b = (w.astype(jnp.bfloat16) for w in (W1, W2, W3m))

    # ---- batch folding onto the lane axis ----
    # Keep >= 2 grid steps when possible so both v7x TensorCores get a chunk;
    # each step processes Nb images as one lane-dense (C, Nb*P) block.
    if N % 2 == 0 and ((N // 2) * P) % 128 == 0:
        n_steps = 2
    elif P % 128 == 0:
        n_steps = N          # odd batch: one image per step
    else:
        n_steps = 1          # single full block (block == full array dims)
    Nb = N // n_steps
    PL = Nb * P

    xcf = jnp.transpose(x, (1, 0, 2, 3)).reshape(C, N * P).astype(jnp.float32)
    mask_bits = _tap_mask_bits(H, W, Nb)

    # v7x has 64 MiB physical VMEM (vs 128 MiB on v5e/v6e); set the scoped
    # limit explicitly with headroom for the double-buffered folded blocks.
    est = 2 * 2 * (C * PL * 4) + 4 * (2 * 9 * C + 3 * Cout * C + 2 * Cout + PL)
    vmem_limit = int(min(48 * 1024 * 1024, max(32 * 1024 * 1024, 8 * est)))

    kernel = _make_gcwm_kernel(H, W, PL)
    out = pl.pallas_call(
        kernel,
        out_shape=jax.ShapeDtypeStruct((C, N * P), jnp.float32),
        grid=(n_steps,),
        in_specs=[
            pl.BlockSpec((1, PL), lambda i: (0, 0)),        # packed tap-validity bits
            pl.BlockSpec((C, PL), lambda i: (0, i)),        # x chunk (Nb images, lane-folded)
            pl.BlockSpec((9, C, 1), lambda i: (0, 0, 0)),   # dw1 taps (tap-major)
            pl.BlockSpec((Cout, C), lambda i: (0, 0)),      # pw1 (BN folded, bf16)
            pl.BlockSpec((Cout, 1), lambda i: (0, 0)),      # bias 1
            pl.BlockSpec((9, C, 1), lambda i: (0, 0, 0)),   # dw2 taps (tap-major)
            pl.BlockSpec((Cout, C), lambda i: (0, 0)),      # pw2 (BN folded, bf16)
            pl.BlockSpec((Cout, 1), lambda i: (0, 0)),      # bias 2
            pl.BlockSpec((C, Cout), lambda i: (0, 0)),      # GCW matrix (bf16)
        ],
        out_specs=pl.BlockSpec((C, PL), lambda i: (0, i)),
        compiler_params=pltpu.CompilerParams(
            dimension_semantics=("parallel",),
            vmem_limit_bytes=vmem_limit),
    )(mask_bits, xcf, w_dw1, W1b, b1, w_dw2, W2b, b2, W3b)
    return jnp.transpose(out.reshape(C, N, H, W), (1, 0, 2, 3))


# --------------------------- pure-JAX reference ---------------------------
def gcwm_reference(x, params, dc):
    def dw(t, w):
        C = t.shape[1]
        return lax.conv_general_dilated(t, w.reshape(C, 1, 3, 3), (1, 1),
                                        ((1, 1), (1, 1)),
                                        dimension_numbers=("NCHW", "OIHW", "NCHW"),
                                        feature_group_count=C)

    def pw(t, w):
        Cout, half = w.shape
        return lax.conv_general_dilated(t, w.reshape(Cout, half, 1, 1), (1, 1),
                                        ((0, 0), (0, 0)),
                                        dimension_numbers=("NCHW", "OIHW", "NCHW"),
                                        feature_group_count=2)

    def bn(t, g, b, m, v):
        g, b, m, v = (u[None, :, None, None] for u in (g, b, m, v))
        return g * (t - m) / jnp.sqrt(v + BN_EPS) + b

    h = dw(x, params["w_dw1"])
    h = jax.nn.relu(bn(pw(h, params["w_pw1"]), params["bn1_gamma"],
                       params["bn1_beta"], params["bn1_mean"], params["bn1_var"]))
    h = dw(h, params["w_dw2"])
    h = jax.nn.relu(bn(pw(h, params["w_pw2"]), params["bn2_gamma"],
                       params["bn2_beta"], params["bn2_mean"], params["bn2_var"]))
    N, Cout, H, W = h.shape
    pd = dc // 2 - 1
    hp = jnp.pad(h, ((0, 0), (pd, pd), (0, 0), (0, 0)))
    dout = Cout // 2
    w3 = params["w3"]
    groups = []
    for g in range(2):
        rows = []
        for d in range(dout):
            acc = sum(w3[g, k] * hp[:, 2 * d + k] for k in range(dc))
            rows.append(acc)
        groups.append(jnp.stack(rows, axis=1))
    y = jax.nn.relu(jnp.concatenate(groups, axis=1))
    return y + x


if __name__ == "__main__":
    N, C, H, W = 4, 16, 16, 16          # in_channels == out_channels (residual add)
    dc = 4                              # GCWConv kernel depth; padding = dc//2 - 1

    key = jax.random.PRNGKey(0)
    ks = jax.random.split(key, 16)
    params = {
        "w_dw1": 0.3 * jax.random.normal(ks[0], (C, 3, 3), jnp.float32),
        "w_pw1": 0.3 * jax.random.normal(ks[1], (C, C // 2), jnp.float32),
        "bn1_gamma": 1.0 + 0.1 * jax.random.normal(ks[2], (C,), jnp.float32),
        "bn1_beta": 0.1 * jax.random.normal(ks[3], (C,), jnp.float32),
        "bn1_mean": 0.1 * jax.random.normal(ks[4], (C,), jnp.float32),
        "bn1_var": 0.5 + jax.random.uniform(ks[5], (C,), jnp.float32),
        "w_dw2": 0.3 * jax.random.normal(ks[6], (C, 3, 3), jnp.float32),
        "w_pw2": 0.3 * jax.random.normal(ks[7], (C, C // 2), jnp.float32),
        "bn2_gamma": 1.0 + 0.1 * jax.random.normal(ks[8], (C,), jnp.float32),
        "bn2_beta": 0.1 * jax.random.normal(ks[9], (C,), jnp.float32),
        "bn2_mean": 0.1 * jax.random.normal(ks[10], (C,), jnp.float32),
        "bn2_var": 0.5 + jax.random.uniform(ks[11], (C,), jnp.float32),
        "w3": 0.3 * jax.random.normal(ks[12], (2, dc), jnp.float32),
    }
    x = jax.random.normal(ks[15], (N, C, H, W), jnp.float32)

    out = jax.block_until_ready(gcwm_forward(x, params))
    ref = gcwm_reference(x, params, dc)

    assert out.shape == x.shape, (out.shape, x.shape)
    max_err = float(jnp.max(jnp.abs(out - ref)))
    # The kernel feeds the MXU bf16 operands (f32 accumulation) while the
    # reference is pure f32, so the expected max abs error is a few 1e-3 at
    # these magnitudes; 5e-2 leaves margin while still catching real bugs.
    assert max_err < 5e-2, f"max abs error {max_err}"
    print("KERNEL_OK")
</pallas_src>

<mosaic_0001>
module attributes {stable_mosaic.version = 11 : i64} {
  func.func @kernel(%arg0: i32, %arg1: memref<1x512xi32, #tpu.memory_space<vmem>>, %arg2: memref<16x512xf32, #tpu.memory_space<vmem>>, %arg3: memref<9x16x1xf32, #tpu.memory_space<vmem>>, %arg4: memref<16x16xbf16, #tpu.memory_space<vmem>>, %arg5: memref<16x1xf32, #tpu.memory_space<vmem>>, %arg6: memref<9x16x1xf32, #tpu.memory_space<vmem>>, %arg7: memref<16x16xbf16, #tpu.memory_space<vmem>>, %arg8: memref<16x1xf32, #tpu.memory_space<vmem>>, %arg9: memref<16x16xbf16, #tpu.memory_space<vmem>>, %arg10: memref<16x512xf32, #tpu.memory_space<vmem>>) attributes {dimension_semantics = [#tpu.dimension_semantics<parallel>], iteration_bounds = array<i64: 2>, scalar_prefetch = 0 : i64, scratch_operands = 0 : i64, tpu.core_type = #tpu.core_type<tc>, window_params = [{pipeline_mode = #tpu.pipeline_mode<synchronous>, transform_indices = @transform_0, window_bounds = array<i64: 1, 512>}, {transform_indices = @transform_1, window_bounds = array<i64: 16, 512>}, {pipeline_mode = #tpu.pipeline_mode<synchronous>, transform_indices = @transform_2, window_bounds = array<i64: 9, 16, 1>}, {pipeline_mode = #tpu.pipeline_mode<synchronous>, transform_indices = @transform_3, window_bounds = array<i64: 16, 16>}, {pipeline_mode = #tpu.pipeline_mode<synchronous>, transform_indices = @transform_4, window_bounds = array<i64: 16, 1>}, {pipeline_mode = #tpu.pipeline_mode<synchronous>, transform_indices = @transform_5, window_bounds = array<i64: 9, 16, 1>}, {pipeline_mode = #tpu.pipeline_mode<synchronous>, transform_indices = @transform_6, window_bounds = array<i64: 16, 16>}, {pipeline_mode = #tpu.pipeline_mode<synchronous>, transform_indices = @transform_7, window_bounds = array<i64: 16, 1>}, {pipeline_mode = #tpu.pipeline_mode<synchronous>, transform_indices = @transform_8, window_bounds = array<i64: 16, 16>}, {transform_indices = @transform_9, window_bounds = array<i64: 16, 512>}]} {
    %c0 = arith.constant 0 : index
    %c0_0 = arith.constant 0 : index
    %0 = vector.load %arg2[%c0, %c0_0] : memref<16x512xf32, #tpu.memory_space<vmem>>, vector<16x512xf32>
    %c0_1 = arith.constant 0 : index
    %c0_2 = arith.constant 0 : index
    %1 = vector.load %arg1[%c0_1, %c0_2] : memref<1x512xi32, #tpu.memory_space<vmem>>, vector<1x512xi32>
    %c4 = arith.constant 4 : index
    %c0_3 = arith.constant 0 : index
    %c0_4 = arith.constant 0 : index
    %2 = vector.load %arg3[%c4, %c0_3, %c0_4] : memref<9x16x1xf32, #tpu.memory_space<vmem>>, vector<1x16x1xf32>
    %3 = vector.shape_cast %2 : vector<1x16x1xf32> to vector<16x1xf32>
    %4 = vector.broadcast %3 : vector<16x1xf32> to vector<16x512xf32>
    %5 = arith.mulf %4, %0 : vector<16x512xf32>
    %c17_i32 = arith.constant 17 : i32
    %6 = tpu.dynamic_rotate %0 by %c17_i32 dim 1 : vector<16x512xf32>, i32 -> vector<16x512xf32>
    %c1_i32 = arith.constant 1 : i32
    %7 = vector.broadcast %c1_i32 : i32 to vector<1x512xi32>
    %8 = arith.andi %1, %7 : vector<1x512xi32>
    %c0_i32 = arith.constant 0 : i32
    %9 = vector.broadcast %c0_i32 : i32 to vector<1x512xi32>
    %10 = arith.cmpi ne, %8, %9 : vector<1x512xi32>
    %c0_5 = arith.constant 0 : index
    %c0_6 = arith.constant 0 : index
    %c0_7 = arith.constant 0 : index
    %11 = vector.load %arg3[%c0_5, %c0_6, %c0_7] : memref<9x16x1xf32, #tpu.memory_space<vmem>>, vector<1x16x1xf32>
    %12 = vector.shape_cast %11 : vector<1x16x1xf32> to vector<16x1xf32>
    %cst = arith.constant 0.000000e+00 : f32
    %13 = vector.shape_cast %10 : vector<1x512xi1> to vector<1x512xi1>
    %14 = vector.broadcast %13 : vector<1x512xi1> to vector<16x512xi1>
    %15 = vector.broadcast %cst : f32 to vector<16x512xf32>
    %16 = arith.select %14, %6, %15 : vector<16x512xi1>, vector<16x512xf32>
    %17 = vector.broadcast %12 : vector<16x1xf32> to vector<16x512xf32>
    %18 = arith.mulf %17, %16 : vector<16x512xf32>
    %19 = arith.addf %5, %18 : vector<16x512xf32>
    %c16_i32 = arith.constant 16 : i32
    %20 = tpu.dynamic_rotate %0 by %c16_i32 dim 1 : vector<16x512xf32>, i32 -> vector<16x512xf32>
    %c2_i32 = arith.constant 2 : i32
    %21 = vector.broadcast %c2_i32 : i32 to vector<1x512xi32>
    %22 = arith.andi %1, %21 : vector<1x512xi32>
    %c0_i32_8 = arith.constant 0 : i32
    %23 = vector.broadcast %c0_i32_8 : i32 to vector<1x512xi32>
    %24 = arith.cmpi ne, %22, %23 : vector<1x512xi32>
    %c1 = arith.constant 1 : index
    %c0_9 = arith.constant 0 : index
    %c0_10 = arith.constant 0 : index
    %25 = vector.load %arg3[%c1, %c0_9, %c0_10] : memref<9x16x1xf32, #tpu.memory_space<vmem>>, vector<1x16x1xf32>
    %26 = vector.shape_cast %25 : vector<1x16x1xf32> to vector<16x1xf32>
    %cst_11 = arith.constant 0.000000e+00 : f32
    %27 = vector.shape_cast %24 : vector<1x512xi1> to vector<1x512xi1>
    %28 = vector.broadcast %27 : vector<1x512xi1> to vector<16x512xi1>
    %29 = vector.broadcast %cst_11 : f32 to vector<16x512xf32>
    %30 = arith.select %28, %20, %29 : vector<16x512xi1>, vector<16x512xf32>
    %31 = vector.broadcast %26 : vector<16x1xf32> to vector<16x512xf32>
    %32 = arith.mulf %31, %30 : vector<16x512xf32>
    %33 = arith.addf %19, %32 : vector<16x512xf32>
    %c15_i32 = arith.constant 15 : i32
    %34 = tpu.dynamic_rotate %0 by %c15_i32 dim 1 : vector<16x512xf32>, i32 -> vector<16x512xf32>
    %c4_i32 = arith.constant 4 : i32
    %35 = vector.broadcast %c4_i32 : i32 to vector<1x512xi32>
    %36 = arith.andi %1, %35 : vector<1x512xi32>
    %c0_i32_12 = arith.constant 0 : i32
    %37 = vector.broadcast %c0_i32_12 : i32 to vector<1x512xi32>
    %38 = arith.cmpi ne, %36, %37 : vector<1x512xi32>
    %c2 = arith.constant 2 : index
    %c0_13 = arith.constant 0 : index
    %c0_14 = arith.constant 0 : index
    %39 = vector.load %arg3[%c2, %c0_13, %c0_14] : memref<9x16x1xf32, #tpu.memory_space<vmem>>, vector<1x16x1xf32>
    %40 = vector.shape_cast %39 : vector<1x16x1xf32> to vector<16x1xf32>
    %cst_15 = arith.constant 0.000000e+00 : f32
    %41 = vector.shape_cast %38 : vector<1x512xi1> to vector<1x512xi1>
    %42 = vector.broadcast %41 : vector<1x512xi1> to vector<16x512xi1>
    %43 = vector.broadcast %cst_15 : f32 to vector<16x512xf32>
    %44 = arith.select %42, %34, %43 : vector<16x512xi1>, vector<16x512xf32>
    %45 = vector.broadcast %40 : vector<16x1xf32> to vector<16x512xf32>
    %46 = arith.mulf %45, %44 : vector<16x512xf32>
    %47 = arith.addf %33, %46 : vector<16x512xf32>
    %c1_i32_16 = arith.constant 1 : i32
    %48 = tpu.dynamic_rotate %0 by %c1_i32_16 dim 1 : vector<16x512xf32>, i32 -> vector<16x512xf32>
    %c8_i32 = arith.constant 8 : i32
    %49 = vector.broadcast %c8_i32 : i32 to vector<1x512xi32>
    %50 = arith.andi %1, %49 : vector<1x512xi32>
    %c0_i32_17 = arith.constant 0 : i32
    %51 = vector.broadcast %c0_i32_17 : i32 to vector<1x512xi32>
    %52 = arith.cmpi ne, %50, %51 : vector<1x512xi32>
    %c3 = arith.constant 3 : index
    %c0_18 = arith.constant 0 : index
    %c0_19 = arith.constant 0 : index
    %53 = vector.load %arg3[%c3, %c0_18, %c0_19] : memref<9x16x1xf32, #tpu.memory_space<vmem>>, vector<1x16x1xf32>
    %54 = vector.shape_cast %53 : vector<1x16x1xf32> to vector<16x1xf32>
    %cst_20 = arith.constant 0.000000e+00 : f32
    %55 = vector.shape_cast %52 : vector<1x512xi1> to vector<1x512xi1>
    %56 = vector.broadcast %55 : vector<1x512xi1> to vector<16x512xi1>
    %57 = vector.broadcast %cst_20 : f32 to vector<16x512xf32>
    %58 = arith.select %56, %48, %57 : vector<16x512xi1>, vector<16x512xf32>
    %59 = vector.broadcast %54 : vector<16x1xf32> to vector<16x512xf32>
    %60 = arith.mulf %59, %58 : vector<16x512xf32>
    %61 = arith.addf %47, %60 : vector<16x512xf32>
    %c511_i32 = arith.constant 511 : i32
    %62 = tpu.dynamic_rotate %0 by %c511_i32 dim 1 : vector<16x512xf32>, i32 -> vector<16x512xf32>
    %c32_i32 = arith.constant 32 : i32
    %63 = vector.broadcast %c32_i32 : i32 to vector<1x512xi32>
    %64 = arith.andi %1, %63 : vector<1x512xi32>
    %c0_i32_21 = arith.constant 0 : i32
    %65 = vector.broadcast %c0_i32_21 : i32 to vector<1x512xi32>
    %66 = arith.cmpi ne, %64, %65 : vector<1x512xi32>
    %c5 = arith.constant 5 : index
    %c0_22 = arith.constant 0 : index
    %c0_23 = arith.constant 0 : index
    %67 = vector.load %arg3[%c5, %c0_22, %c0_23] : memref<9x16x1xf32, #tpu.memory_space<vmem>>, vector<1x16x1xf32>
    %68 = vector.shape_cast %67 : vector<1x16x1xf32> to vector<16x1xf32>
    %cst_24 = arith.constant 0.000000e+00 : f32
    %69 = vector.shape_cast %66 : vector<1x512xi1> to vector<1x512xi1>
    %70 = vector.broadcast %69 : vector<1x512xi1> to vector<16x512xi1>
    %71 = vector.broadcast %cst_24 : f32 to vector<16x512xf32>
    %72 = arith.select %70, %62, %71 : vector<16x512xi1>, vector<16x512xf32>
    %73 = vector.broadcast %68 : vector<16x1xf32> to vector<16x512xf32>
    %74 = arith.mulf %73, %72 : vector<16x512xf32>
    %75 = arith.addf %61, %74 : vector<16x512xf32>
    %c497_i32 = arith.constant 497 : i32
    %76 = tpu.dynamic_rotate %0 by %c497_i32 dim 1 : vector<16x512xf32>, i32 -> vector<16x512xf32>
    %c64_i32 = arith.constant 64 : i32
    %77 = vector.broadcast %c64_i32 : i32 to vector<1x512xi32>
    %78 = arith.andi %1, %77 : vector<1x512xi32>
    %c0_i32_25 = arith.constant 0 : i32
    %79 = vector.broadcast %c0_i32_25 : i32 to vector<1x512xi32>
    %80 = arith.cmpi ne, %78, %79 : vector<1x512xi32>
    %c6 = arith.constant 6 : index
    %c0_26 = arith.constant 0 : index
    %c0_27 = arith.constant 0 : index
    %81 = vector.load %arg3[%c6, %c0_26, %c0_27] : memref<9x16x1xf32, #tpu.memory_space<vmem>>, vector<1x16x1xf32>
    %82 = vector.shape_cast %81 : vector<1x16x1xf32> to vector<16x1xf32>
    %cst_28 = arith.constant 0.000000e+00 : f32
    %83 = vector.shape_cast %80 : vector<1x512xi1> to vector<1x512xi1>
    %84 = vector.broadcast %83 : vector<1x512xi1> to vector<16x512xi1>
    %85 = vector.broadcast %cst_28 : f32 to vector<16x512xf32>
    %86 = arith.select %84, %76, %85 : vector<16x512xi1>, vector<16x512xf32>
    %87 = vector.broadcast %82 : vector<16x1xf32> to vector<16x512xf32>
    %88 = arith.mulf %87, %86 : vector<16x512xf32>
    %89 = arith.addf %75, %88 : vector<16x512xf32>
    %c496_i32 = arith.constant 496 : i32
    %90 = tpu.dynamic_rotate %0 by %c496_i32 dim 1 : vector<16x512xf32>, i32 -> vector<16x512xf32>
    %c128_i32 = arith.constant 128 : i32
    %91 = vector.broadcast %c128_i32 : i32 to vector<1x512xi32>
    %92 = arith.andi %1, %91 : vector<1x512xi32>
    %c0_i32_29 = arith.constant 0 : i32
    %93 = vector.broadcast %c0_i32_29 : i32 to vector<1x512xi32>
    %94 = arith.cmpi ne, %92, %93 : vector<1x512xi32>
    %c7 = arith.constant 7 : index
    %c0_30 = arith.constant 0 : index
    %c0_31 = arith.constant 0 : index
    %95 = vector.load %arg3[%c7, %c0_30, %c0_31] : memref<9x16x1xf32, #tpu.memory_space<vmem>>, vector<1x16x1xf32>
    %96 = vector.shape_cast %95 : vector<1x16x1xf32> to vector<16x1xf32>
    %cst_32 = arith.constant 0.000000e+00 : f32
    %97 = vector.shape_cast %94 : vector<1x512xi1> to vector<1x512xi1>
    %98 = vector.broadcast %97 : vector<1x512xi1> to vector<16x512xi1>
    %99 = vector.broadcast %cst_32 : f32 to vector<16x512xf32>
    %100 = arith.select %98, %90, %99 : vector<16x512xi1>, vector<16x512xf32>
    %101 = vector.broadcast %96 : vector<16x1xf32> to vector<16x512xf32>
    %102 = arith.mulf %101, %100 : vector<16x512xf32>
    %103 = arith.addf %89, %102 : vector<16x512xf32>
    %c495_i32 = arith.constant 495 : i32
    %104 = tpu.dynamic_rotate %0 by %c495_i32 dim 1 : vector<16x512xf32>, i32 -> vector<16x512xf32>
    %c256_i32 = arith.constant 256 : i32
    %105 = vector.broadcast %c256_i32 : i32 to vector<1x512xi32>
    %106 = arith.andi %1, %105 : vector<1x512xi32>
    %c0_i32_33 = arith.constant 0 : i32
    %107 = vector.broadcast %c0_i32_33 : i32 to vector<1x512xi32>
    %108 = arith.cmpi ne, %106, %107 : vector<1x512xi32>
    %c8 = arith.constant 8 : index
    %c0_34 = arith.constant 0 : index
    %c0_35 = arith.constant 0 : index
    %109 = vector.load %arg3[%c8, %c0_34, %c0_35] : memref<9x16x1xf32, #tpu.memory_space<vmem>>, vector<1x16x1xf32>
    %110 = vector.shape_cast %109 : vector<1x16x1xf32> to vector<16x1xf32>
    %cst_36 = arith.constant 0.000000e+00 : f32
    %111 = vector.shape_cast %108 : vector<1x512xi1> to vector<1x512xi1>
    %112 = vector.broadcast %111 : vector<1x512xi1> to vector<16x512xi1>
    %113 = vector.broadcast %cst_36 : f32 to vector<16x512xf32>
    %114 = arith.select %112, %104, %113 : vector<16x512xi1>, vector<16x512xf32>
    %115 = vector.broadcast %110 : vector<16x1xf32> to vector<16x512xf32>
    %116 = arith.mulf %115, %114 : vector<16x512xf32>
    %117 = arith.addf %103, %116 : vector<16x512xf32>
    %c0_37 = arith.constant 0 : index
    %c0_38 = arith.constant 0 : index
    %118 = vector.load %arg4[%c0_37, %c0_38] : memref<16x16xbf16, #tpu.memory_space<vmem>>, vector<16x16xbf16>
    %119 = arith.truncf %117 : vector<16x512xf32> to vector<16x512xbf16>
    %cst_39 = arith.constant dense<0.000000e+00> : vector<16x512xf32>
    %120 = tpu.matmul %118, %119, %cst_39 {dimension_numbers = #tpu.dot_dimension_numbers<[1], [0], [0], [1], [0, 0, 1, 1], [], []>} : vector<16x16xbf16>, vector<16x512xbf16>, vector<16x512xf32> -> vector<16x512xf32>
    %c0_40 = arith.constant 0 : index
    %c0_41 = arith.constant 0 : index
    %121 = vector.load %arg5[%c0_40, %c0_41] : memref<16x1xf32, #tpu.memory_space<vmem>>, vector<16x1xf32>
    %122 = vector.broadcast %121 : vector<16x1xf32> to vector<16x512xf32>
    %123 = arith.addf %120, %122 : vector<16x512xf32>
    %cst_42 = arith.constant 0.000000e+00 : f32
    %124 = vector.broadcast %cst_42 : f32 to vector<16x512xf32>
    %125 = arith.maximumf %123, %124 : vector<16x512xf32>
    %c0_43 = arith.constant 0 : index
    %c0_44 = arith.constant 0 : index
    %126 = vector.load %arg1[%c0_43, %c0_44] : memref<1x512xi32, #tpu.memory_space<vmem>>, vector<1x512xi32>
    %c4_45 = arith.constant 4 : index
    %c0_46 = arith.constant 0 : index
    %c0_47 = arith.constant 0 : index
    %127 = vector.load %arg6[%c4_45, %c0_46, %c0_47] : memref<9x16x1xf32, #tpu.memory_space<vmem>>, vector<1x16x1xf32>
    %128 = vector.shape_cast %127 : vector<1x16x1xf32> to vector<16x1xf32>
    %129 = vector.broadcast %128 : vector<16x1xf32> to vector<16x512xf32>
    %130 = arith.mulf %129, %125 : vector<16x512xf32>
    %c17_i32_48 = arith.constant 17 : i32
    %131 = tpu.dynamic_rotate %125 by %c17_i32_48 dim 1 : vector<16x512xf32>, i32 -> vector<16x512xf32>
    %c1_i32_49 = arith.constant 1 : i32
    %132 = vector.broadcast %c1_i32_49 : i32 to vector<1x512xi32>
    %133 = arith.andi %126, %132 : vector<1x512xi32>
    %c0_i32_50 = arith.constant 0 : i32
    %134 = vector.broadcast %c0_i32_50 : i32 to vector<1x512xi32>
    %135 = arith.cmpi ne, %133, %134 : vector<1x512xi32>
    %c0_51 = arith.constant 0 : index
    %c0_52 = arith.constant 0 : index
    %c0_53 = arith.constant 0 : index
    %136 = vector.load %arg6[%c0_51, %c0_52, %c0_53] : memref<9x16x1xf32, #tpu.memory_space<vmem>>, vector<1x16x1xf32>
    %137 = vector.shape_cast %136 : vector<1x16x1xf32> to vector<16x1xf32>
    %cst_54 = arith.constant 0.000000e+00 : f32
    %138 = vector.shape_cast %135 : vector<1x512xi1> to vector<1x512xi1>
    %139 = vector.broadcast %138 : vector<1x512xi1> to vector<16x512xi1>
    %140 = vector.broadcast %cst_54 : f32 to vector<16x512xf32>
    %141 = arith.select %139, %131, %140 : vector<16x512xi1>, vector<16x512xf32>
    %142 = vector.broadcast %137 : vector<16x1xf32> to vector<16x512xf32>
    %143 = arith.mulf %142, %141 : vector<16x512xf32>
    %144 = arith.addf %130, %143 : vector<16x512xf32>
    %c16_i32_55 = arith.constant 16 : i32
    %145 = tpu.dynamic_rotate %125 by %c16_i32_55 dim 1 : vector<16x512xf32>, i32 -> vector<16x512xf32>
    %c2_i32_56 = arith.constant 2 : i32
    %146 = vector.broadcast %c2_i32_56 : i32 to vector<1x512xi32>
    %147 = arith.andi %126, %146 : vector<1x512xi32>
    %c0_i32_57 = arith.constant 0 : i32
    %148 = vector.broadcast %c0_i32_57 : i32 to vector<1x512xi32>
    %149 = arith.cmpi ne, %147, %148 : vector<1x512xi32>
    %c1_58 = arith.constant 1 : index
    %c0_59 = arith.constant 0 : index
    %c0_60 = arith.constant 0 : index
    %150 = vector.load %arg6[%c1_58, %c0_59, %c0_60] : memref<9x16x1xf32, #tpu.memory_space<vmem>>, vector<1x16x1xf32>
    %151 = vector.shape_cast %150 : vector<1x16x1xf32> to vector<16x1xf32>
    %cst_61 = arith.constant 0.000000e+00 : f32
    %152 = vector.shape_cast %149 : vector<1x512xi1> to vector<1x512xi1>
    %153 = vector.broadcast %152 : vector<1x512xi1> to vector<16x512xi1>
    %154 = vector.broadcast %cst_61 : f32 to vector<16x512xf32>
    %155 = arith.select %153, %145, %154 : vector<16x512xi1>, vector<16x512xf32>
    %156 = vector.broadcast %151 : vector<16x1xf32> to vector<16x512xf32>
    %157 = arith.mulf %156, %155 : vector<16x512xf32>
    %158 = arith.addf %144, %157 : vector<16x512xf32>
    %c15_i32_62 = arith.constant 15 : i32
    %159 = tpu.dynamic_rotate %125 by %c15_i32_62 dim 1 : vector<16x512xf32>, i32 -> vector<16x512xf32>
    %c4_i32_63 = arith.constant 4 : i32
    %160 = vector.broadcast %c4_i32_63 : i32 to vector<1x512xi32>
    %161 = arith.andi %126, %160 : vector<1x512xi32>
    %c0_i32_64 = arith.constant 0 : i32
    %162 = vector.broadcast %c0_i32_64 : i32 to vector<1x512xi32>
    %163 = arith.cmpi ne, %161, %162 : vector<1x512xi32>
    %c2_65 = arith.constant 2 : index
    %c0_66 = arith.constant 0 : index
    %c0_67 = arith.constant 0 : index
    %164 = vector.load %arg6[%c2_65, %c0_66, %c0_67] : memref<9x16x1xf32, #tpu.memory_space<vmem>>, vector<1x16x1xf32>
    %165 = vector.shape_cast %164 : vector<1x16x1xf32> to vector<16x1xf32>
    %cst_68 = arith.constant 0.000000e+00 : f32
    %166 = vector.shape_cast %163 : vector<1x512xi1> to vector<1x512xi1>
    %167 = vector.broadcast %166 : vector<1x512xi1> to vector<16x512xi1>
    %168 = vector.broadcast %cst_68 : f32 to vector<16x512xf32>
    %169 = arith.select %167, %159, %168 : vector<16x512xi1>, vector<16x512xf32>
    %170 = vector.broadcast %165 : vector<16x1xf32> to vector<16x512xf32>
    %171 = arith.mulf %170, %169 : vector<16x512xf32>
    %172 = arith.addf %158, %171 : vector<16x512xf32>
    %c1_i32_69 = arith.constant 1 : i32
    %173 = tpu.dynamic_rotate %125 by %c1_i32_69 dim 1 : vector<16x512xf32>, i32 -> vector<16x512xf32>
    %c8_i32_70 = arith.constant 8 : i32
    %174 = vector.broadcast %c8_i32_70 : i32 to vector<1x512xi32>
    %175 = arith.andi %126, %174 : vector<1x512xi32>
    %c0_i32_71 = arith.constant 0 : i32
    %176 = vector.broadcast %c0_i32_71 : i32 to vector<1x512xi32>
    %177 = arith.cmpi ne, %175, %176 : vector<1x512xi32>
    %c3_72 = arith.constant 3 : index
    %c0_73 = arith.constant 0 : index
    %c0_74 = arith.constant 0 : index
    %178 = vector.load %arg6[%c3_72, %c0_73, %c0_74] : memref<9x16x1xf32, #tpu.memory_space<vmem>>, vector<1x16x1xf32>
    %179 = vector.shape_cast %178 : vector<1x16x1xf32> to vector<16x1xf32>
    %cst_75 = arith.constant 0.000000e+00 : f32
    %180 = vector.shape_cast %177 : vector<1x512xi1> to vector<1x512xi1>
    %181 = vector.broadcast %180 : vector<1x512xi1> to vector<16x512xi1>
    %182 = vector.broadcast %cst_75 : f32 to vector<16x512xf32>
    %183 = arith.select %181, %173, %182 : vector<16x512xi1>, vector<16x512xf32>
    %184 = vector.broadcast %179 : vector<16x1xf32> to vector<16x512xf32>
    %185 = arith.mulf %184, %183 : vector<16x512xf32>
    %186 = arith.addf %172, %185 : vector<16x512xf32>
    %c511_i32_76 = arith.constant 511 : i32
    %187 = tpu.dynamic_rotate %125 by %c511_i32_76 dim 1 : vector<16x512xf32>, i32 -> vector<16x512xf32>
    %c32_i32_77 = arith.constant 32 : i32
    %188 = vector.broadcast %c32_i32_77 : i32 to vector<1x512xi32>
    %189 = arith.andi %126, %188 : vector<1x512xi32>
    %c0_i32_78 = arith.constant 0 : i32
    %190 = vector.broadcast %c0_i32_78 : i32 to vector<1x512xi32>
    %191 = arith.cmpi ne, %189, %190 : vector<1x512xi32>
    %c5_79 = arith.constant 5 : index
    %c0_80 = arith.constant 0 : index
    %c0_81 = arith.constant 0 : index
    %192 = vector.load %arg6[%c5_79, %c0_80, %c0_81] : memref<9x16x1xf32, #tpu.memory_space<vmem>>, vector<1x16x1xf32>
    %193 = vector.shape_cast %192 : vector<1x16x1xf32> to vector<16x1xf32>
    %cst_82 = arith.constant 0.000000e+00 : f32
    %194 = vector.shape_cast %191 : vector<1x512xi1> to vector<1x512xi1>
    %195 = vector.broadcast %194 : vector<1x512xi1> to vector<16x512xi1>
    %196 = vector.broadcast %cst_82 : f32 to vector<16x512xf32>
    %197 = arith.select %195, %187, %196 : vector<16x512xi1>, vector<16x512xf32>
    %198 = vector.broadcast %193 : vector<16x1xf32> to vector<16x512xf32>
    %199 = arith.mulf %198, %197 : vector<16x512xf32>
    %200 = arith.addf %186, %199 : vector<16x512xf32>
    %c497_i32_83 = arith.constant 497 : i32
    %201 = tpu.dynamic_rotate %125 by %c497_i32_83 dim 1 : vector<16x512xf32>, i32 -> vector<16x512xf32>
    %c64_i32_84 = arith.constant 64 : i32
    %202 = vector.broadcast %c64_i32_84 : i32 to vector<1x512xi32>
    %203 = arith.andi %126, %202 : vector<1x512xi32>
    %c0_i32_85 = arith.constant 0 : i32
    %204 = vector.broadcast %c0_i32_85 : i32 to vector<1x512xi32>
    %205 = arith.cmpi ne, %203, %204 : vector<1x512xi32>
    %c6_86 = arith.constant 6 : index
    %c0_87 = arith.constant 0 : index
    %c0_88 = arith.constant 0 : index
    %206 = vector.load %arg6[%c6_86, %c0_87, %c0_88] : memref<9x16x1xf32, #tpu.memory_space<vmem>>, vector<1x16x1xf32>
    %207 = vector.shape_cast %206 : vector<1x16x1xf32> to vector<16x1xf32>
    %cst_89 = arith.constant 0.000000e+00 : f32
    %208 = vector.shape_cast %205 : vector<1x512xi1> to vector<1x512xi1>
    %209 = vector.broadcast %208 : vector<1x512xi1> to vector<16x512xi1>
    %210 = vector.broadcast %cst_89 : f32 to vector<16x512xf32>
    %211 = arith.select %209, %201, %210 : vector<16x512xi1>, vector<16x512xf32>
    %212 = vector.broadcast %207 : vector<16x1xf32> to vector<16x512xf32>
    %213 = arith.mulf %212, %211 : vector<16x512xf32>
    %214 = arith.addf %200, %213 : vector<16x512xf32>
    %c496_i32_90 = arith.constant 496 : i32
    %215 = tpu.dynamic_rotate %125 by %c496_i32_90 dim 1 : vector<16x512xf32>, i32 -> vector<16x512xf32>
    %c128_i32_91 = arith.constant 128 : i32
    %216 = vector.broadcast %c128_i32_91 : i32 to vector<1x512xi32>
    %217 = arith.andi %126, %216 : vector<1x512xi32>
    %c0_i32_92 = arith.constant 0 : i32
    %218 = vector.broadcast %c0_i32_92 : i32 to vector<1x512xi32>
    %219 = arith.cmpi ne, %217, %218 : vector<1x512xi32>
    %c7_93 = arith.constant 7 : index
    %c0_94 = arith.constant 0 : index
    %c0_95 = arith.constant 0 : index
    %220 = vector.load %arg6[%c7_93, %c0_94, %c0_95] : memref<9x16x1xf32, #tpu.memory_space<vmem>>, vector<1x16x1xf32>
    %221 = vector.shape_cast %220 : vector<1x16x1xf32> to vector<16x1xf32>
    %cst_96 = arith.constant 0.000000e+00 : f32
    %222 = vector.shape_cast %219 : vector<1x512xi1> to vector<1x512xi1>
    %223 = vector.broadcast %222 : vector<1x512xi1> to vector<16x512xi1>
    %224 = vector.broadcast %cst_96 : f32 to vector<16x512xf32>
    %225 = arith.select %223, %215, %224 : vector<16x512xi1>, vector<16x512xf32>
    %226 = vector.broadcast %221 : vector<16x1xf32> to vector<16x512xf32>
    %227 = arith.mulf %226, %225 : vector<16x512xf32>
    %228 = arith.addf %214, %227 : vector<16x512xf32>
    %c495_i32_97 = arith.constant 495 : i32
    %229 = tpu.dynamic_rotate %125 by %c495_i32_97 dim 1 : vector<16x512xf32>, i32 -> vector<16x512xf32>
    %c256_i32_98 = arith.constant 256 : i32
    %230 = vector.broadcast %c256_i32_98 : i32 to vector<1x512xi32>
    %231 = arith.andi %126, %230 : vector<1x512xi32>
    %c0_i32_99 = arith.constant 0 : i32
    %232 = vector.broadcast %c0_i32_99 : i32 to vector<1x512xi32>
    %233 = arith.cmpi ne, %231, %232 : vector<1x512xi32>
    %c8_100 = arith.constant 8 : index
    %c0_101 = arith.constant 0 : index
    %c0_102 = arith.constant 0 : index
    %234 = vector.load %arg6[%c8_100, %c0_101, %c0_102] : memref<9x16x1xf32, #tpu.memory_space<vmem>>, vector<1x16x1xf32>
    %235 = vector.shape_cast %234 : vector<1x16x1xf32> to vector<16x1xf32>
    %cst_103 = arith.constant 0.000000e+00 : f32
    %236 = vector.shape_cast %233 : vector<1x512xi1> to vector<1x512xi1>
    %237 = vector.broadcast %236 : vector<1x512xi1> to vector<16x512xi1>
    %238 = vector.broadcast %cst_103 : f32 to vector<16x512xf32>
    %239 = arith.select %237, %229, %238 : vector<16x512xi1>, vector<16x512xf32>
    %240 = vector.broadcast %235 : vector<16x1xf32> to vector<16x512xf32>
    %241 = arith.mulf %240, %239 : vector<16x512xf32>
    %242 = arith.addf %228, %241 : vector<16x512xf32>
    %c0_104 = arith.constant 0 : index
    %c0_105 = arith.constant 0 : index
    %243 = vector.load %arg7[%c0_104, %c0_105] : memref<16x16xbf16, #tpu.memory_space<vmem>>, vector<16x16xbf16>
    %244 = arith.truncf %242 : vector<16x512xf32> to vector<16x512xbf16>
    %cst_106 = arith.constant dense<0.000000e+00> : vector<16x512xf32>
    %245 = tpu.matmul %243, %244, %cst_106 {dimension_numbers = #tpu.dot_dimension_numbers<[1], [0], [0], [1], [0, 0, 1, 1], [], []>} : vector<16x16xbf16>, vector<16x512xbf16>, vector<16x512xf32> -> vector<16x512xf32>
    %c0_107 = arith.constant 0 : index
    %c0_108 = arith.constant 0 : index
    %246 = vector.load %arg8[%c0_107, %c0_108] : memref<16x1xf32, #tpu.memory_space<vmem>>, vector<16x1xf32>
    %247 = vector.broadcast %246 : vector<16x1xf32> to vector<16x512xf32>
    %248 = arith.addf %245, %247 : vector<16x512xf32>
    %cst_109 = arith.constant 0.000000e+00 : f32
    %249 = vector.broadcast %cst_109 : f32 to vector<16x512xf32>
    %250 = arith.maximumf %248, %249 : vector<16x512xf32>
    %c0_110 = arith.constant 0 : index
    %c0_111 = arith.constant 0 : index
    %251 = vector.load %arg9[%c0_110, %c0_111] : memref<16x16xbf16, #tpu.memory_space<vmem>>, vector<16x16xbf16>
    %252 = arith.truncf %250 : vector<16x512xf32> to vector<16x512xbf16>
    %cst_112 = arith.constant dense<0.000000e+00> : vector<16x512xf32>
    %253 = tpu.matmul %251, %252, %cst_112 {dimension_numbers = #tpu.dot_dimension_numbers<[1], [0], [0], [1], [0, 0, 1, 1], [], []>} : vector<16x16xbf16>, vector<16x512xbf16>, vector<16x512xf32> -> vector<16x512xf32>
    %cst_113 = arith.constant 0.000000e+00 : f32
    %254 = vector.broadcast %cst_113 : f32 to vector<16x512xf32>
    %255 = arith.maximumf %253, %254 : vector<16x512xf32>
    %c0_114 = arith.constant 0 : index
    %c0_115 = arith.constant 0 : index
    %256 = vector.load %arg2[%c0_114, %c0_115] : memref<16x512xf32, #tpu.memory_space<vmem>>, vector<16x512xf32>
    %257 = arith.addf %255, %256 : vector<16x512xf32>
    %c0_116 = arith.constant 0 : index
    %c0_117 = arith.constant 0 : index
    %258 = vector.load %arg10[%c0_116, %c0_117] : memref<16x512xf32, #tpu.memory_space<vmem>>, vector<16x512xf32>
    tpu.vector_store %arg10[%c0_116, %c0_117], %257 {strides = array<i32>} : memref<16x512xf32, #tpu.memory_space<vmem>>, vector<16x512xf32>,
    return
  }
  func.func @transform_0(%arg0: i32) -> (i32, i32) {
    %c0_i32 = arith.constant 0 : i32
    %c0_i32_0 = arith.constant 0 : i32
    %c0_i32_1 = arith.constant 0 : i32
    return %c0_i32, %c0_i32_0 : i32, i32
  }
  func.func @transform_1(%arg0: i32) -> (i32, i32) {
    %c0_i32 = arith.constant 0 : i32
    %c0_i32_0 = arith.constant 0 : i32
    return %c0_i32, %arg0 : i32, i32
  }
  func.func @transform_2(%arg0: i32) -> (i32, i32, i32) {
    %c0_i32 = arith.constant 0 : i32
    %c0_i32_0 = arith.constant 0 : i32
    %c0_i32_1 = arith.constant 0 : i32
    %c0_i32_2 = arith.constant 0 : i32
    return %c0_i32, %c0_i32_0, %c0_i32_1 : i32, i32, i32
  }
  func.func @transform_3(%arg0: i32) -> (i32, i32) {
    %c0_i32 = arith.constant 0 : i32
    %c0_i32_0 = arith.constant 0 : i32
    %c0_i32_1 = arith.constant 0 : i32
    return %c0_i32, %c0_i32_0 : i32, i32
  }
  func.func @transform_4(%arg0: i32) -> (i32, i32) {
    %c0_i32 = arith.constant 0 : i32
    %c0_i32_0 = arith.constant 0 : i32
    %c0_i32_1 = arith.constant 0 : i32
    return %c0_i32, %c0_i32_0 : i32, i32
  }
  func.func @transform_5(%arg0: i32) -> (i32, i32, i32) {
    %c0_i32 = arith.constant 0 : i32
    %c0_i32_0 = arith.constant 0 : i32
    %c0_i32_1 = arith.constant 0 : i32
    %c0_i32_2 = arith.constant 0 : i32
    return %c0_i32, %c0_i32_0, %c0_i32_1 : i32, i32, i32
  }
  func.func @transform_6(%arg0: i32) -> (i32, i32) {
    %c0_i32 = arith.constant 0 : i32
    %c0_i32_0 = arith.constant 0 : i32
    %c0_i32_1 = arith.constant 0 : i32
    return %c0_i32, %c0_i32_0 : i32, i32
  }
  func.func @transform_7(%arg0: i32) -> (i32, i32) {
    %c0_i32 = arith.constant 0 : i32
    %c0_i32_0 = arith.constant 0 : i32
    %c0_i32_1 = arith.constant 0 : i32
    return %c0_i32, %c0_i32_0 : i32, i32
  }
  func.func @transform_8(%arg0: i32) -> (i32, i32) {
    %c0_i32 = arith.constant 0 : i32
    %c0_i32_0 = arith.constant 0 : i32
    %c0_i32_1 = arith.constant 0 : i32
    return %c0_i32, %c0_i32_0 : i32, i32
  }
  func.func @transform_9(%arg0: i32) -> (i32, i32) {
    %c0_i32 = arith.constant 0 : i32
    %c0_i32_0 = arith.constant 0 : i32
    return %c0_i32, %arg0 : i32, i32
  }
}

</mosaic_0001>

<bundles_post_ra>
// kernel: tpu_custom_call.1
= control target key start
LH: loop header
LB: loop body
LE: loop exit
PB: predicated region body
PF: predicated region fallthrough
CT: control target
= control target key end

     0   :  { %14 = vsyncpa [#allocation4], 0  ;;  %s4278_s0 = inlined_call_operand.vmem [shape: s32[1,512], index: 0, kind: input, shape index: {}]   ;;  %s4279_s1 = inlined_call_operand.vmem [shape: f32[16,1024], index: 1, kind: input, shape index: {}]   ;;  %s4280_s2 = inlined_call_operand.vmem [shape: f32[9,16,1], index: 2, kind: input, shape index: {}]   ;;  %s4281_s3 = inlined_call_operand.vmem [shape: bf16[16,16], index: 3, kind: input, shape index: {}]   ;;  %s4282_s4 = inlined_call_operand.vmem [shape: f32[16,1], index: 4, kind: input, shape index: {}]   ;;  %s4283_s5 = inlined_call_operand.vmem [shape: f32[9,16,1], index: 5, kind: input, shape index: {}]   ;;  %s4284_s6 = inlined_call_operand.vmem [shape: bf16[16,16], index: 6, kind: input, shape index: {}]   ;;  %s4285_s7 = inlined_call_operand.vmem [shape: f32[16,1], index: 7, kind: input, shape index: {}]   ;;  %s4286_s8 = inlined_call_operand.vmem [shape: bf16[16,16], index: 8, kind: input, shape index: {}]   ;;  %s4287_s9 = inlined_call_operand.hbm [shape: f32[16,1024], index: 9, kind: output, shape index: {}]  }
   0x1   :  { %16 = vsyncpa [#allocation4 + $0x1], 0  ;;  %s2282_s30 = smov 0   ;;  %s2284_s10 = smov 0  }
   0x2   :  { %s2286_s11 = smov 0   ;;  %s2288_s12 = smov 0  }
   0x3 LB: > { %s4289_s13 = sadd.s32 4294967295, %s2217_s12   ;;  %s2034_s14 = sadd.s32 4294967294, %s2217_s12   ;;  %s2217_s12 = sphi %s2288_s12, %s4803_s12   ;;  %s2213_s11 = sphi %s2286_s11, %s4802_s11   ;;  %s2209_s10 = sphi %s2284_s10, %s4801_s10   ;;  %s2205_s30 = sphi %s2282_s30, %s4800_s30  }
   0x4   : > { %s2305_s15 = sadd.s32 1, %s2217_s12   ;;  %s50_s16 = sadd.s32 1, %s2213_s11 }
   0x5   : > { %s47_s17 = ssub.s32 %s2217_s12, %s2305_s15  ;;  %p57_p0 = scmp.ne.s32.totalorder %s2213_s11, %s2209_s10 }
   0x6   : > { %p48_p1 = scmp.eq.s32.totalorder %s47_s17, 0  ;;  %p58_p2 = scmp.eq.s32.totalorder %s2217_s12, 0 }
   0x7   : > { %p234_p3 = scmp.eq.s32.totalorder %s4289_s13, 1  ;;  %p239_p4 = scmp.ne.s32.totalorder %s2209_s10, %s2205_s30 }
   0x8   : > { %s2318_s18 = scalar_select %p48_p1, %s2213_s11, %s50_s16  }
   0x9   : > { %p59_p5 = por %p58_p2, %p57_p0  ;;  %p2320_p6 = por %p234_p3, %p57_p0 }
   0xa   : > { %p240_p7 = scmp.eq.s32.totalorder %s2034_s14, 1  ;;  %p2036_p9 = scmp.ge.s32.totalorder %s2217_s12, 2 }
   0xc   : > { %p2324_p8 = por %p240_p7, %p239_p4  ;;  %280 = sbr.rel (%p2036_p9) target bundleno = 27 (0x1b), region = 48 }
  0x13   : > { %283 = sbr.rel (!%p59_p5) target bundleno = 27 (0x1b), region = 52  ;;  %s285_s21 = sand.u32 (%p59_p5), 1, %s2213_s11  }
  0x14   : > { %s2089_s22 = sshll.u32 (%p59_p5), %s2217_s12, 5  ;;  %s2037_s23 = sshll.u32 (%p59_p5), %s285_s21, 6 }
  0x15   : > { %s290_s26 = scalar_lea.vmem (%p59_p5), %s4279_s1, %s2089_s22  ;;  %s287_s27 = scalar_lea.vmem (%p59_p5), [#allocation2], %s2037_s23 }
  0x16   : > { %v303_v0 = vld [vmem:[%s290_s26] sm:$0xff] (%p59_p5)  ;;  %v305_v1 = vld [vmem:[%s290_s26 + $0x8] sm:$0xff] (%p59_p5)  ;;  %v307_v2 = vld [vmem:[%s290_s26 + $0x10] sm:$0xff] (%p59_p5) }
  0x17   : > { %304 = vst [vmem:[%s287_s27] sm:$0xff] (%p59_p5), %v303_v0  ;;  %306 = vst [vmem:[%s287_s27 + $0x8] sm:$0xff] (%p59_p5), %v305_v1  ;;  %v309_v3 = vld [vmem:[%s290_s26 + $0x18] sm:$0xff] (%p59_p5)  ;;  %v311_v4 = vld [vmem:[%s290_s26 + $0x40] sm:$0xff] (%p59_p5) }
  0x18   : > { %308 = vst [vmem:[%s287_s27 + $0x10] sm:$0xff] (%p59_p5), %v307_v2  ;;  %v313_v5 = vld [vmem:[%s290_s26 + $0x48] sm:$0xff] (%p59_p5)  ;;  %310 = vst [vmem:[%s287_s27 + $0x18] sm:$0xff] (%p59_p5), %v309_v3  ;;  %v315_v6 = vld [vmem:[%s290_s26 + $0x50] sm:$0xff] (%p59_p5) }
  0x19   : > { %312 = vst [vmem:[%s287_s27 + $0x20] sm:$0xff] (%p59_p5), %v311_v4  ;;  %314 = vst [vmem:[%s287_s27 + $0x28] sm:$0xff] (%p59_p5), %v313_v5  ;;  %v317_v7 = vld [vmem:[%s290_s26 + $0x58] sm:$0xff] (%p59_p5) }
  0x1a   : > { %316 = vst [vmem:[%s287_s27 + $0x30] sm:$0xff] %v315_v6  ;;  %318 = vst [vmem:[%s287_s27 + $0x38] sm:$0xff] %v317_v7 }
  0x1b PF: > { %p2040_p10 = scmp.ge.s32.totalorder %s2217_s12, 1  ;;  %p323_p11 = scmp.lt.s32.totalorder %s2217_s12, 3 }
  0x1d   : > { %p324_p12 = pnand %p2040_p10, %p323_p11 }
  0x1f   : > { %327 = sbr.rel (%p324_p12) target bundleno = 1291 (0x50b), region = 75 }
  0x26   : > { %v427_v8 = vld [vmem:[%s4280_s2] sm:$0xff]  ;;  %v4303_v10 = vmov 0   ;;  %v428_v11 = vld [vmem:[%s4280_s2 + $0x8] sm:$0xff]  ;;  %s4288_s24 = sand.u32 1, %s2209_s10   ;;  %v2046_v13 = vld [vmem:[%s4280_s2 + $0x18] sm:$0xff]  ;;  %s2220_s23 = smov 17  }
  0x27   : > { %v2043_v9 = vld [vmem:[%s4280_s2 + $0x40] sm:$0xff]  ;;  %2143 = vset.pattern.permute.xlu1 %v4303_v10  ;;  %2142 = vset.pattern.permute.xlu0 %v4303_v10  ;;  %v2044_v12 = vld [vmem:[%s4280_s2 + $0x48] sm:$0xff]  ;;  %v2045_v14 = vld [vmem:[%s4280_s2 + $0x10] sm:$0xff]  ;;  %s2363_s29 = sshll.u32 %s4288_s24, 6  ;;  %s2221_s14 = smov 16  }
  0x28   : > { %460 = vperm.xlu1 %2143, %v427_v8   ;;  %382 = vperm.xlu0 %2142, %v2043_v9   ;;  %v2048_v15 = vld [vmem:[%s4280_s2 + $0x28] sm:$0xff]  ;;  %v2047_v16 = vld [vmem:[%s4280_s2 + $0x20] sm:$0xff]  ;;  %s2372_s22 = scalar_lea.vmem [#allocation2], %s2363_s29  ;;  %v2050_v25 = vld [vmem:[%s4280_s2 + $0x38] sm:$0xff]  ;;  %s2222_s26 = smov 15  }
  0x29   : > { %1138 = vmatprep.mubr.bf16.mxu0 %v4303_v10  ;;  %1181 = vmatprep.mubr.bf16.mxu1 %v4303_v10  ;;  %v2375_v17 = vld [vmem:[%s2372_s22 + $0x20] sm:$0xff]  ;;  %v2385_v19 = vld [vmem:[%s2372_s22 + $0x28] sm:$0xff]  ;;  %v2395_v21 = vld [vmem:[%s2372_s22 + $0x30] sm:$0xff]  ;;  %s4296_s21 = smov 1   ;;  %s4294_s17 = smov 127  }
  0x2a   : > { %v2378_v18 = vld [vmem:[%s2372_s22] sm:$0xff]  ;;  %v2388_v20 = vld [vmem:[%s2372_s22 + $0x8] sm:$0xff]  ;;  %v2398_v22 = vld [vmem:[%s2372_s22 + $0x10] sm:$0xff]  ;;  %s4292_s24 = smov 113   ;;  %s4290_s25 = smov 112  }
  0x2b   : > { %v2405_v23 = vld [vmem:[%s2372_s22 + $0x38] sm:$0xff]  ;;  %v2049_v26 = vld [vmem:[%s4280_s2 + $0x30] sm:$0xff]  ;;  %v2054_v29 = vld [vmem:[%s4280_s2 + $0x68] sm:$0xff]  ;;  %s4298_s27 = smov 111   ;;  %s4658_s13 = smov 111  }
  0x2c   : > { %465 = vperm.xlu1 %2143, %v428_v11   ;;  %387 = vperm.xlu0 %2142, %v2044_v12   ;;  %v2408_v24 = vld [vmem:[%s2372_s22 + $0x18] sm:$0xff]  ;;  %v2051_v28 = vld [vmem:[%s4280_s2 + $0x50] sm:$0xff]  ;;  %v2053_v30 = vld [vmem:[%s4280_s2 + $0x60] sm:$0xff] }
  0x2d   : > { %v2052_v27 = vld [vmem:[%s4280_s2 + $0x58] sm:$0xff]  ;;  %v2055_v32 = vld [vmem:[%s4280_s2 + $0x70] sm:$0xff]  ;;  %v2058_v33 = vld [vmem:[%s4280_s2 + $0x88] sm:$0xff] }
  0x2e   : > { %v2056_v31 = vld [vmem:[%s4280_s2 + $0x78] sm:$0xff]  ;;  %v2057_v34 = vld [vmem:[%s4280_s2 + $0x80] sm:$0xff]  ;;  %v1086_v53 = vld [vmem:[%s4282_s4 + $0x8] sm:$0xff] }
  0x2f   : > { %v1085_v54 = vld [vmem:[%s4282_s4] sm:$0xff]  ;;  %v2063_v57 = vld [vmem:[%s4283_s5 + $0x48] sm:$0xff]  ;;  %v2065_v1 = vld [vmem:[%s4283_s5 + $0x18] sm:$0xff] }
  0x30   : > { %550 = vperm.xlu1 %2143, %v2046_v13   ;;  %545 = vperm.xlu0 %2142, %v2045_v14   ;;  %v2062_v58 = vld [vmem:[%s4283_s5 + $0x40] sm:$0xff]  ;;  %v1246_v61 = vld [vmem:[%s4283_s5 + $0x8] sm:$0xff]  ;;  %v2064_v2 = vld [vmem:[%s4283_s5 + $0x10] sm:$0xff] }
  0x31   : > { %v1245_v62 = vld [vmem:[%s4283_s5] sm:$0xff]  ;;  %v2067_v5 = vld [vmem:[%s4283_s5 + $0x28] sm:$0xff]  ;;  %v2069_v9 = vld [vmem:[%s4283_s5 + $0x38] sm:$0xff] }
  0x32   : > { %v2066_v6 = vld [vmem:[%s4283_s5 + $0x20] sm:$0xff]  ;;  %v2068_v11 = vld [vmem:[%s4283_s5 + $0x30] sm:$0xff]  ;;  %v2071_v14 = vld [vmem:[%s4283_s5 + $0x58] sm:$0xff] }
  0x34   : > { %635 = vperm.xlu1 %2143, %v2048_v15   ;;  %630 = vperm.xlu0 %2142, %v2047_v16   ;;  %v2070_v15 = vld [vmem:[%s4283_s5 + $0x50] sm:$0xff] }
  0x38   : > { %400 = vrot.lane.b32.xlu1 %v2375_v17, %s2220_s23  ;;  %398 = vrot.lane.b32.xlu0 %v2378_v18, %s2220_s23 }
  0x3c   : > { %404 = vrot.lane.b32.xlu1 %v2385_v19, %s2220_s23  ;;  %402 = vrot.lane.b32.xlu0 %v2388_v20, %s2220_s23 }
  0x40   : > { %408 = vrot.lane.b32.xlu1 %v2395_v21, %s2220_s23  ;;  %406 = vrot.lane.b32.xlu0 %v2398_v22, %s2220_s23 }
  0x44   : > { %412 = vrot.lane.b32.xlu1 %v2405_v23, %s2220_s23  ;;  %410 = vrot.lane.b32.xlu0 %v2408_v24, %s2220_s23 }
  0x48   : > { %720 = vperm.xlu1 %2143, %v2050_v25   ;;  %715 = vperm.xlu0 %2142, %v2049_v26   ;;  %v2073_v26 = vld [vmem:[%s4283_s5 + $0x68] sm:$0xff] }
  0x4c   : > { %486 = vrot.lane.b32.xlu1 %v2375_v17, %s2221_s14  ;;  %484 = vrot.lane.b32.xlu0 %v2378_v18, %s2221_s14 }
  0x50   : > { %490 = vrot.lane.b32.xlu1 %v2385_v19, %s2221_s14  ;;  %488 = vrot.lane.b32.xlu0 %v2388_v20, %s2221_s14 }
  0x54   : > { %494 = vrot.lane.b32.xlu1 %v2395_v21, %s2221_s14  ;;  %492 = vrot.lane.b32.xlu0 %v2398_v22, %s2221_s14 }
  0x58   : > { %498 = vrot.lane.b32.xlu1 %v2405_v23, %s2221_s14  ;;  %496 = vrot.lane.b32.xlu0 %v2408_v24, %s2221_s14 }
  0x5c   : > { %805 = vperm.xlu1 %2143, %v2052_v27   ;;  %800 = vperm.xlu0 %2142, %v2051_v28   ;;  %v2072_v27 = vld [vmem:[%s4283_s5 + $0x60] sm:$0xff] }
  0x60   : > { %571 = vrot.lane.b32.xlu1 %v2375_v17, %s2222_s26  ;;  %569 = vrot.lane.b32.xlu0 %v2378_v18, %s2222_s26 }
  0x64   : > { %575 = vrot.lane.b32.xlu1 %v2385_v19, %s2222_s26  ;;  %573 = vrot.lane.b32.xlu0 %v2388_v20, %s2222_s26 }
  0x68   : > { %579 = vrot.lane.b32.xlu1 %v2395_v21, %s2222_s26  ;;  %577 = vrot.lane.b32.xlu0 %v2398_v22, %s2222_s26 }
  0x6c   : > { %583 = vrot.lane.b32.xlu1 %v2405_v23, %s2222_s26  ;;  %581 = vrot.lane.b32.xlu0 %v2408_v24, %s2222_s26 }
  0x70   : > { %890 = vperm.xlu1 %2143, %v2054_v29   ;;  %885 = vperm.xlu0 %2142, %v2053_v30   ;;  %v2075_v30 = vld [vmem:[%s4283_s5 + $0x78] sm:$0xff] }
  0x74   : > { %656 = vrot.lane.b32.xlu1 %v2375_v17, %s4296_s21  ;;  %654 = vrot.lane.b32.xlu0 %v2378_v18, %s4296_s21 }
  0x78   : > { %660 = vrot.lane.b32.xlu1 %v2385_v19, %s4296_s21  ;;  %658 = vrot.lane.b32.xlu0 %v2388_v20, %s4296_s21 }
  0x7c   : > { %664 = vrot.lane.b32.xlu1 %v2395_v21, %s4296_s21  ;;  %662 = vrot.lane.b32.xlu0 %v2398_v22, %s4296_s21 }
  0x80   : > { %668 = vrot.lane.b32.xlu1 %v2405_v23, %s4296_s21  ;;  %666 = vrot.lane.b32.xlu0 %v2408_v24, %s4296_s21  ;;  %s4655_s21 = smov 127  }
  0x84   : > { %975 = vperm.xlu1 %2143, %v2056_v31   ;;  %970 = vperm.xlu0 %2142, %v2055_v32   ;;  %v2074_v31 = vld [vmem:[%s4283_s5 + $0x70] sm:$0xff] }
  0x88   : > { %741 = vrot.lane.b32.xlu1 %v2375_v17, %s4294_s17  ;;  %739 = vrot.lane.b32.xlu0 %v2378_v18, %s4294_s17 }
  0x8c   : > { %745 = vrot.lane.b32.xlu1 %v2385_v19, %s4294_s17  ;;  %743 = vrot.lane.b32.xlu0 %v2388_v20, %s4294_s17 }
  0x90   : > { %749 = vrot.lane.b32.xlu1 %v2395_v21, %s4294_s17  ;;  %747 = vrot.lane.b32.xlu0 %v2398_v22, %s4294_s17 }
  0x94   : > { %753 = vrot.lane.b32.xlu1 %v2405_v23, %s4294_s17  ;;  %751 = vrot.lane.b32.xlu0 %v2408_v24, %s4294_s17  ;;  %s4656_s17 = smov 113  }
  0x98   : > { %1060 = vperm.xlu1 %2143, %v2058_v33   ;;  %1055 = vperm.xlu0 %2142, %v2057_v34   ;;  %v2077_v34 = vld [vmem:[%s4283_s5 + $0x88] sm:$0xff] }
  0x9c   : > { %826 = vrot.lane.b32.xlu1 %v2375_v17, %s4292_s24  ;;  %824 = vrot.lane.b32.xlu0 %v2378_v18, %s4292_s24 }
  0xa0   : > { %830 = vrot.lane.b32.xlu1 %v2385_v19, %s4292_s24  ;;  %828 = vrot.lane.b32.xlu0 %v2388_v20, %s4292_s24 }
  0xa4   : > { %834 = vrot.lane.b32.xlu1 %v2395_v21, %s4292_s24  ;;  %832 = vrot.lane.b32.xlu0 %v2398_v22, %s4292_s24 }
  0xa7   : > { %v2520_v35 = vpop.permute.xlu1 %460  ;;  %v2522_v36 = vpop.permute.xlu0 %382 }
  0xa8   : > { %838 = vrot.lane.b32.xlu1 %v2405_v23, %s4292_s24  ;;  %836 = vrot.lane.b32.xlu0 %v2408_v24, %s4292_s24  ;;  %s4654_s24 = smov 1  }
  0xab   : > { %v2528_v37 = vpop.permute.xlu1 %465  ;;  %v2530_v38 = vpop.permute.xlu0 %387 }
  0xac   : > { %911 = vrot.lane.b32.xlu1 %v2375_v17, %s4290_s25  ;;  %909 = vrot.lane.b32.xlu0 %v2378_v18, %s4290_s25 }
  0xaf   : > { %v2536_v39 = vpop.permute.xlu1 %550  ;;  %v2538_v40 = vpop.permute.xlu0 %545 }
  0xb0   : > { %915 = vrot.lane.b32.xlu1 %v2385_v19, %s4290_s25  ;;  %913 = vrot.lane.b32.xlu0 %v2388_v20, %s4290_s25 }
  0xb3   : > { %v2544_v41 = vpop.permute.xlu1 %635  ;;  %v2546_v42 = vpop.permute.xlu0 %630 }
  0xb4   : > { %4445 = vst [vmem:[#allocation6_spill] sm:$0xff] %v2546_v42  ;;  %919 = vrot.lane.b32.xlu1 %v2395_v21, %s4290_s25  ;;  %917 = vrot.lane.b32.xlu0 %v2398_v22, %s4290_s25 }
  0xb7   : > { %v2552_v43 = vpop.permute.xlu1 %400  ;;  %v2554_v44 = vpop.permute.xlu0 %398 }
  0xb8   : > { %923 = vrot.lane.b32.xlu1 %v2405_v23, %s4290_s25  ;;  %921 = vrot.lane.b32.xlu0 %v2408_v24, %s4290_s25  ;;  %s4799_s25 = sand.u32 1, %s2209_s10  }
  0xb9   : > { %s4236_s28 = scalar_lea.sflag [#allocation4], %s4799_s25 }
  0xbb   : > { %v2560_v45 = vpop.permute.xlu1 %404  ;;  %v2562_v46 = vpop.permute.xlu0 %402 }
  0xbc   : > { %996 = vrot.lane.b32.xlu1 %v2375_v17, %s4298_s27  ;;  %994 = vrot.lane.b32.xlu0 %v2378_v18, %s4298_s27 }
  0xbf   : > { %v2568_v47 = vpop.permute.xlu1 %408  ;;  %v2570_v48 = vpop.permute.xlu0 %406 }
  0xc0   : > { %1000 = vrot.lane.b32.xlu1 %v2385_v19, %s4298_s27  ;;  %998 = vrot.lane.b32.xlu0 %v2388_v20, %s4298_s27 }
  0xc3   : > { %v2576_v49 = vpop.permute.xlu1 %412  ;;  %v2578_v50 = vpop.permute.xlu0 %410 }
  0xc4   : > { %1004 = vrot.lane.b32.xlu1 %v2395_v21, %s4298_s27  ;;  %1002 = vrot.lane.b32.xlu0 %v2398_v22, %s4298_s27 }
  0xc7   : > { %v2584_v51 = vpop.permute.xlu1 %720  ;;  %v2586_v52 = vpop.permute.xlu0 %715 }
  0xc8   : > { %4446 = vst [vmem:[#allocation7_spill] sm:$0xff] %v2584_v51  ;;  %4447 = vst [vmem:[#allocation8_spill] sm:$0xff] %v2586_v52  ;;  %1008 = vrot.lane.b32.xlu1 %v2405_v23, %s4298_s27  ;;  %1006 = vrot.lane.b32.xlu0 %v2408_v24, %s4298_s27  ;;  %s4657_s27 = smov 112  }
  0xcb   : > { %v2598_v55 = vpop.permute.xlu1 %486  ;;  %v2600_v56 = vpop.permute.xlu0 %484 }
  0xcc   : > { %1094 = vperm.xlu1 %2143, %v1086_v53   ;;  %1089 = vperm.xlu0 %2142, %v1085_v54   ;;  %v2688_v53 = vld [vmem:[%s4278_s0] sm:$0xf] }
  0xcd   : > { %v2076_v54 = vld [vmem:[%s4283_s5 + $0x80] sm:$0xff] }
  0xcf   : > { %v2608_v59 = vpop.permute.xlu1 %490  ;;  %v2610_v60 = vpop.permute.xlu0 %488 }
  0xd0   : > { %1210 = vperm.xlu1 %2143, %v2063_v57   ;;  %1205 = vperm.xlu0 %2142, %v2062_v58   ;;  %v414_v57 = vlaneseq }
  0xd3   : > { %v2618_v63 = vpop.permute.xlu1 %494  ;;  %v2620_v0 = vpop.permute.xlu0 %492 }
  0xd4   : > { %1262 = vperm.xlu1 %2143, %v1246_v61   ;;  %1257 = vperm.xlu0 %2142, %v1245_v62   ;;  %v425_v62 = vand.u32 1, %v2688_v53 }
  0xd6   : > { %vm426_vm0 = vcmp.ne.s32.totalorder %v425_v62, 0 }
  0xd7   : > { %v2628_v3 = vpop.permute.xlu1 %498  ;;  %v2630_v4 = vpop.permute.xlu0 %496 }
  0xd8   : > { %1323 = vperm.xlu1 %2143, %v2065_v1   ;;  %1318 = vperm.xlu0 %2142, %v2064_v2   ;;  %v431_v1 = vshrl.u32 %v414_v57, 7 }
  0xdb   : > { %v2638_v7 = vpop.permute.xlu1 %805  ;;  %v2640_v8 = vpop.permute.xlu0 %800 }
  0xdc   : > { %4448 = vst [vmem:[#allocation9_spill] sm:$0xff] %v2638_v7  ;;  %4449 = vst [vmem:[#allocation10_spill] sm:$0xff] %v2640_v8  ;;  %1384 = vperm.xlu1 %2143, %v2067_v5   ;;  %1379 = vperm.xlu0 %2142, %v2066_v6   ;;  %v2702_v6 = vsub.s32 1, %v431_v1  ;;  %v2724_v8 = vsub.s32 3, %v431_v1  ;;  %v849_v7 = vand.u32 64, %v2688_v53 }
  0xde   : > { %vm850_vm8 = vcmp.ne.s32.totalorder %v849_v7, 0 }
  0xdf   : > { %v2648_v12 = vpop.permute.xlu1 %571  ;;  %v2650_v13 = vpop.permute.xlu0 %569 }
  0xe0   : > { %1445 = vperm.xlu1 %2143, %v2069_v9   ;;  %1440 = vperm.xlu0 %2142, %v2068_v11   ;;  %v2704_v9 = vsub.s32 2, %v431_v1  ;;  %v509_v11 = vand.u32 2, %v2688_v53 }
  0xe2   : > { %vm510_vm1 = vcmp.ne.s32.totalorder %v509_v11, 0  ;;  %v4463_v11 = vmov 0 }
  0xe3   : > { %v2658_v16 = vpop.permute.xlu1 %575  ;;  %v2660_v25 = vpop.permute.xlu0 %573 }
  0xe4   : > { %1506 = vperm.xlu1 %2143, %v2071_v14   ;;  %1501 = vperm.xlu0 %2142, %v2070_v15  }
  0xe7   : > { %v2668_v28 = vpop.permute.xlu1 %579  ;;  %v2670_v29 = vpop.permute.xlu0 %577 }
  0xe8   : > { %4450 = vst [vmem:[#allocation11_spill] sm:$0xff] %v2668_v28  ;;  %4451 = vst [vmem:[#allocation12_spill] sm:$0xff] %v2670_v29  ;;  %1567 = vperm.xlu1 %2143, %v2073_v26   ;;  %1562 = vperm.xlu0 %2142, %v2072_v27   ;;  %v429_v26 = vsel %vm426_vm0, 1, %v4303_v10  ;;  %v594_v27 = vand.u32 4, %v2688_v53  ;;  %v764_v10 = vand.u32 32, %v2688_v53  ;;  %v395_v28 = vmul.f32 %v2530_v38, %v2385_v19 }
  0xea   : > { %vm595_vm2 = vcmp.ne.s32.totalorder %v594_v27, 0  ;;  %v4468_v27 = vmov 0  ;;  %vm765_vm7 = vcmp.ne.s32.totalorder %v764_v10, 0  ;;  %v1019_v10 = vand.u32 256, %v2688_v53 }
  0xeb   : > { %v2678_v32 = vpop.permute.xlu1 %583  ;;  %v2680_v33 = vpop.permute.xlu0 %581 }
  0xec   : > { %4452 = vst [vmem:[#allocation13_spill] sm:$0xff] %v2678_v32  ;;  %4453 = vst [vmem:[#allocation14_spill] sm:$0xff] %v2680_v33  ;;  %1628 = vperm.xlu1 %2143, %v2075_v30   ;;  %1623 = vperm.xlu0 %2142, %v2074_v31   ;;  %v679_v30 = vand.u32 8, %v2688_v53  ;;  %v2714_v31 = vand.u32 127, %v414_v57  ;;  %v4462_v57 = vmov 0   ;;  %v4477_v32 = vmov 0 }
  0xed   : > { %v514_v52 = vsel %vm510_vm1, 1, %v4462_v57  ;;  %v2735_v51 = vsel %vm595_vm2, 1, %v4462_v57  ;;  %v2767_v7 = vsel %vm765_vm7, 1, %v4462_v57  ;;  %vm2845_vm14 = vcmp.ne.s32.totalorder %v1019_v10, 0 }
  0xee   : > { %vm680_vm3 = vcmp.ne.s32.totalorder %v679_v30, 0  ;;  %vm4334_vm4 = vcmp.lt.s32.totalorder %v2714_v31, 17  ;;  %v445_v30 = vrot.slane %v429_v26, %v2724_v8  ;;  %4473 = vst [vmem:[#allocation29_spill] sm:$0xff] %v2767_v7  ;;  %vm4329_vm9 = vcmp.lt.s32.totalorder %v2714_v31, 16 }
  0xef   : > { %v2693_v58 = vpop.permute.xlu1 %890  ;;  %v2695_v61 = vpop.permute.xlu0 %885  ;;  %v4482_v7 = vmov 0  ;;  %v4493_v10 = vmov 0  ;;  %vm4339_vm2 = vcmp.lt.s32.totalorder %v2714_v31, 15 }
  0xf0   : > { %4454 = vst [vmem:[#allocation15_spill] sm:$0xff] %v2693_v58  ;;  %4455 = vst [vmem:[#allocation16_spill] sm:$0xff] %v2695_v61  ;;  %1689 = vperm.xlu1 %2143, %v2077_v34   ;;  %1684 = vperm.xlu0 %2142, %v2076_v54   ;;  %v437_v34 = vrot.slane %v429_v26, %v2702_v6  ;;  %v441_v54 = vrot.slane %v429_v26, %v2704_v9  ;;  %v2722_v58 = vsub.s32 0, %v431_v1 }
  0xf1   : > { %vm2795_vm11 = vcmp.eq.s32.totalorder %v445_v30, 1  ;;  %v419_v30 = vsel %vm4334_vm4, %v2562_v46, %v2570_v48 }
  0xf2   : > { %vm2730_vm5 = vcmp.eq.s32.totalorder %v437_v34, 1  ;;  %vm2741_vm6 = vcmp.eq.s32.totalorder %v441_v54, 1  ;;  %v522_v34 = vrot.slane %v514_v52, %v2702_v6  ;;  %v530_v54 = vrot.slane %v514_v52, %v2724_v8 }
  0xf3   : > { %v2698_v2 = vpop.permute.xlu1 %656  ;;  %v2700_v5 = vpop.permute.xlu0 %654  ;;  %v4464_v11 = vsel %vm2730_vm5, 4294967295, %v4463_v11  ;;  %v4469_v27 = vsel %vm2741_vm6, 4294967295, %v4468_v27  ;;  %v4478_v32 = vsel %vm2795_vm11, 4294967295, %v4477_v32 }
  0xf4   : > { %4456 = vst [vmem:[#allocation17_spill] sm:$0xff] %v2698_v2  ;;  %4457 = vst [vmem:[#allocation18_spill] sm:$0xff] %v2700_v5  ;;  %v526_v5 = vrot.slane %v514_v52, %v2704_v9  ;;  %vm2829_vm13 = vcmp.eq.s32.totalorder %v522_v34, 1  ;;  %vm2863_vm1 = vcmp.eq.s32.totalorder %v530_v54, 1 }
  0xf5   : > { %4465 = vst [vmem:[#allocation23_spill] sm:$0xff] %v4464_v11  ;;  %4470 = vst [vmem:[#allocation26_spill] sm:$0xff] %v4469_v27  ;;  %v4483_v7 = vsel %vm2829_vm13, 4294967295, %v4482_v7  ;;  %v4487_v11 = vmov 0  ;;  %v4494_v10 = vsel %vm2863_vm1, 4294967295, %v4493_v10  ;;  %v396_v27 = vmul.f32 %v2530_v38, %v2395_v21 }
  0xf6   : > { %4479 = vst [vmem:[#allocation31_spill] sm:$0xff] %v4478_v32  ;;  %4484 = vst [vmem:[#allocation32_spill] sm:$0xff] %v4483_v7  ;;  %vm2855_vm15 = vcmp.eq.s32.totalorder %v526_v5, 1  ;;  %v2878_v5 = vmul.f32 %v2530_v38, %v2375_v17  ;;  %v2898_v17 = vsel %vm2845_vm14, 1, %v4462_v57  ;;  %v4497_v21 = vrot.slane %v2735_v51, %v2702_v6 }
  0xf7   : > { %v2707_v14 = vpop.permute.xlu1 %660  ;;  %v2709_v15 = vpop.permute.xlu0 %658  ;;  %v4488_v11 = vsel %vm2855_vm15, 4294967295, %v4487_v11  ;;  %4495 = vst [vmem:[#allocation35_spill] sm:$0xff] %v4494_v10  ;;  %4496 = vst [vmem:[#allocation36_spill] sm:$0xff] %v2898_v17 }
  0xf8   : > { %4458 = vst [vmem:[#allocation19_spill] sm:$0xff] %v2707_v14  ;;  %4459 = vst [vmem:[#allocation20_spill] sm:$0xff] %v2709_v15  ;;  %v2750_v15 = vsel %vm680_vm3, 1, %v4462_v57  ;;  %vm2925_vm3 = vcmp.eq.s32.totalorder %v4497_v21, 1  ;;  %v505_v21 = vsel %vm4329_vm9, %v2600_v56, %v2610_v60 }
  0xf9   : > { %4489 = vst [vmem:[#allocation33_spill] sm:$0xff] %v4488_v11 }
  0xfb   : > { %v2718_v62 = vpop.permute.xlu1 %664  ;;  %v2720_v61 = vpop.permute.xlu0 %662 }
  0xfc   : > { %4460 = vst [vmem:[#allocation21_spill] sm:$0xff] %v2718_v62  ;;  %4461 = vst [vmem:[#allocation22_spill] sm:$0xff] %v2720_v61  ;;  %v433_v62 = vrot.slane %v429_v26, %v2722_v58  ;;  %v2777_v26 = vsel %vm850_vm8, 1, %v4462_v57 }
  0xfe   : > { %vm2791_vm10 = vcmp.eq.s32.totalorder %v433_v62, 1  ;;  %v420_v62 = vsel %vm4334_vm4, %v2560_v45, %v2568_v47 }
  0xff   : > { %v2737_v61 = vpop.permute.xlu1 %668  ;;  %v2739_v1 = vpop.permute.xlu0 %666  ;;  %v456_v42 = vsel %vm2741_vm6, %v420_v62, 0.0  ;;  %v2874_v62 = vmul.f32 %v2522_v36, %v2408_v24  ;;  %v2892_v24 = vmul.f32 %v2530_v38, %v2405_v23  ;;  %v418_v23 = vsel %vm4334_vm4, %v2568_v47, %v2576_v49 }
 0x100   : > { %4466 = vst [vmem:[#allocation24_spill] sm:$0xff] %v2737_v61  ;;  %4467 = vst [vmem:[#allocation25_spill] sm:$0xff] %v2739_v1  ;;  %v518_v61 = vrot.slane %v514_v52, %v2722_v58  ;;  %v934_v52 = vand.u32 128, %v2688_v53  ;;  %v4474_v1 = vmov 0  ;;  %v424_v38 = vsel %vm4334_vm4, %v2576_v49, %v2552_v43 }
 0x101   : > { %v4475_v1 = vsel %vm2791_vm10, 4294967295, %v4474_v1  ;;  %v4498_v47 = vmov 0 }
 0x102   : > { %4476 = vst [vmem:[#allocation30_spill] sm:$0xff] %v4475_v1  ;;  %vm2821_vm12 = vcmp.ne.s32.totalorder %v934_v52, 0  ;;  %v2839_v52 = vmul.f32 %v2522_v36, %v2378_v18  ;;  %v452_v18 = vsel %vm2741_vm6, %v419_v30, 0.0  ;;  %vm2859_vm0 = vcmp.eq.s32.totalorder %v518_v61, 1 }
 0x103   : > { %v2762_v14 = vpop.permute.xlu1 %975  ;;  %v2764_v33 = vpop.permute.xlu0 %970  ;;  %v4499_v47 = vsel %vm2925_vm3, 4294967295, %v4498_v47 }
 0x104   : > { %4471 = vst [vmem:[#allocation27_spill] sm:$0xff] %v2762_v14  ;;  %4472 = vst [vmem:[#allocation28_spill] sm:$0xff] %v2764_v33  ;;  %v422_v33 = vsel %vm4334_vm4, %v2552_v43, %v2560_v45  ;;  %v421_v14 = vsel %vm4334_vm4, %v2554_v44, %v2562_v46  ;;  %v392_v46 = vmul.f32 %v2522_v36, %v2398_v22  ;;  %v2870_v22 = vsel %vm2821_vm12, 1, %v4462_v57 }
 0x105   : > { %v455_v53 = vsel %vm2730_vm5, %v422_v33, 0.0  ;;  %v451_v45 = vsel %vm2730_vm5, %v421_v14, 0.0  ;;  %v391_v33 = vmul.f32 %v2522_v36, %v2388_v20  ;;  %v4490_v20 = vmov 0  ;;  %4500 = vst [vmem:[#allocation37_spill] sm:$0xff] %v4499_v47  ;;  %v4553_v47 = vld [vmem:[#allocation22_spill] sm:$0xff] }
 0x106   : > { %v4491_v20 = vsel %vm2859_vm0, 4294967295, %v4490_v20  ;;  %v473_v61 = vmul.f32 %v2528_v37, %v455_v53  ;;  %v469_v54 = vmul.f32 %v2520_v35, %v451_v45  ;;  %v474_v36 = vmul.f32 %v2528_v37, %v456_v42 }
 0x107   : > { %v2815_v29 = vpop.permute.xlu1 %741  ;;  %v2817_v2 = vpop.permute.xlu0 %739  ;;  %4492 = vst [vmem:[#allocation34_spill] sm:$0xff] %v4491_v20  ;;  %v470_v53 = vmul.f32 %v2520_v35, %v452_v18  ;;  %v457_v45 = vsel %vm2795_vm11, %v418_v23, 0.0  ;;  %v4519_v20 = vrot.slane %v2750_v15, %v2704_v9 }
 0x108   : > { %v2918_v34 = vadd.f32 %v473_v61, %v395_v28  ;;  %v2920_v18 = vadd.f32 %v469_v54, %v391_v33  ;;  %v417_v33 = vsel %vm4334_vm4, %v2570_v48, %v2578_v50  ;;  %v423_v54 = vsel %vm4334_vm4, %v2578_v50, %v2554_v44 }
 0x109   : > { %v506_v28 = vsel %vm4329_vm9, %v2598_v55, %v2608_v59  ;;  %v482_v61 = vadd.f32 %v474_v36, %v396_v27  ;;  %v478_v49 = vadd.f32 %v470_v53, %v392_v46  ;;  %v454_v48 = vsel %vm2791_vm10, %v424_v38, 0.0 }
 0x10a   : > { %v504_v44 = vsel %vm4329_vm9, %v2608_v59, %v2618_v63  ;;  %v503_v50 = vsel %vm4329_vm9, %v2610_v60, %v2620_v0  ;;  %v502_v27 = vsel %vm4329_vm9, %v2618_v63, %v2628_v3  ;;  %v508_v46 = vsel %vm4329_vm9, %v2628_v3, %v2598_v55 }
 0x10b   : > { %v2882_v30 = vpop.permute.xlu1 %745  ;;  %v2884_v14 = vpop.permute.xlu0 %743  ;;  %v450_v36 = vsel %vm2791_vm10, %v423_v54, 0.0  ;;  %v453_v59 = vsel %vm2795_vm11, %v417_v33, 0.0  ;;  %v540_v53 = vsel %vm2829_vm13, %v506_v28, 0.0  ;;  %v536_v60 = vsel %vm2829_vm13, %v505_v21, 0.0 }
 0x10c   : > { %v472_v38 = vmul.f32 %v2528_v37, %v454_v48  ;;  %v475_v55 = vmul.f32 %v2528_v37, %v457_v45  ;;  %v501_v3 = vsel %vm4329_vm9, %v2620_v0, %v2630_v4  ;;  %v507_v33 = vsel %vm4329_vm9, %v2630_v4, %v2600_v56 }
 0x10d   : > { %v541_v54 = vsel %vm2855_vm15, %v504_v44, 0.0  ;;  %v537_v28 = vsel %vm2855_vm15, %v503_v50, 0.0  ;;  %v539_v37 = vsel %vm2859_vm0, %v508_v46, 0.0  ;;  %v542_v45 = vsel %vm2863_vm1, %v502_v27, 0.0 }
 0x10e   : > { %v4501_v0 = vrot.slane %v2735_v51, %v2704_v9  ;;  %v4502_v21 = vmov 0  ;;  %v468_v56 = vmul.f32 %v2520_v35, %v450_v36  ;;  %v471_v4 = vmul.f32 %v2520_v35, %v453_v59 }
 0x10f   : > { %v2929_v19 = vpop.permute.xlu1 %749  ;;  %v2931_v43 = vpop.permute.xlu0 %747  ;;  %v558_v48 = vmul.f32 %v2536_v39, %v540_v53  ;;  %v554_v44 = vmul.f32 %v2538_v40, %v536_v60  ;;  %v4505_v50 = vrot.slane %v2735_v51, %v2722_v58  ;;  %v4506_v27 = vmov 0 }
 0x110   : > { %vm3007_vm8 = vcmp.eq.s32.totalorder %v4501_v0, 1  ;;  %v4509_v46 = vrot.slane %v2735_v51, %v2724_v8  ;;  %v4510_v0 = vmov 0  ;;  %v535_v35 = vsel %vm2859_vm0, %v507_v33, 0.0 }
 0x111   : > { %v4503_v21 = vsel %vm3007_vm8, 4294967295, %v4502_v21  ;;  %vm3018_vm12 = vcmp.eq.s32.totalorder %v4505_v50, 1  ;;  %v538_v36 = vsel %vm2863_vm1, %v501_v3, 0.0  ;;  %v591_v59 = vsel %vm4339_vm2, %v2648_v12, %v2658_v16 }
 0x112   : > { %4504 = vst [vmem:[#allocation38_spill] sm:$0xff] %v4503_v21  ;;  %v4507_v27 = vsel %vm3018_vm12, 4294967295, %v4506_v27  ;;  %vm3025_vm14 = vcmp.eq.s32.totalorder %v4509_v46, 1  ;;  %v590_v51 = vsel %vm4339_vm2, %v2650_v13, %v2660_v25  ;;  %v4513_v53 = vrot.slane %v2750_v15, %v2702_v6 }
 0x113   : > { %v2981_v23 = vpop.permute.xlu1 %753  ;;  %v2983_v63 = vpop.permute.xlu0 %751  ;;  %4508 = vst [vmem:[#allocation39_spill] sm:$0xff] %v4507_v27  ;;  %v4511_v0 = vsel %vm3025_vm14, 4294967295, %v4510_v0  ;;  %v4514_v60 = vmov 0  ;;  %v559_v50 = vmul.f32 %v2536_v39, %v541_v54  ;;  %v555_v46 = vmul.f32 %v2538_v40, %v537_v28 }
 0x114   : > { %4512 = vst [vmem:[#allocation40_spill] sm:$0xff] %v4511_v0  ;;  %vm3044_vm9 = vcmp.eq.s32.totalorder %v4513_v53, 1  ;;  %v557_v42 = vmul.f32 %v2536_v39, %v539_v37  ;;  %v560_v10 = vmul.f32 %v2536_v39, %v542_v45  ;;  %vm3059_vm4 = vcmp.eq.s32.totalorder %v4519_v20, 1 }
 0x115   : > { %v4515_v60 = vsel %vm3044_vm9, 4294967295, %v4514_v60  ;;  %v4520_v53 = vmov 0  ;;  %v480_v11 = vadd.f32 %v472_v38, %v2878_v5  ;;  %v483_v7 = vadd.f32 %v475_v55, %v2892_v24 }
 0x116   : > { %4516 = vst [vmem:[#allocation41_spill] sm:$0xff] %v4515_v60  ;;  %v4521_v53 = vsel %vm3059_vm4, 4294967295, %v4520_v53  ;;  %v553_v37 = vmul.f32 %v2538_v40, %v535_v35  ;;  %v556_v39 = vmul.f32 %v2538_v40, %v538_v36  ;;  %v625_v20 = vsel %vm2925_vm3, %v591_v59, 0.0  ;;  %v4562_v60 = vld [vmem:[#allocation8_spill] sm:$0xff] }
 0x117   : > { %v3048_v33 = vpop.permute.xlu1 %1060  ;;  %v3050_v3 = vpop.permute.xlu0 %1055  ;;  %4522 = vst [vmem:[#allocation44_spill] sm:$0xff] %v4521_v53  ;;  %v621_v45 = vsel %vm2925_vm3, %v590_v51, 0.0  ;;  %v476_v5 = vadd.f32 %v468_v56, %v2839_v52  ;;  %v479_v24 = vadd.f32 %v471_v4, %v2874_v62  ;;  %v566_v38 = vadd.f32 %v558_v48, %v2918_v34  ;;  %v4528_v56 = vld [vmem:[#allocation11_spill] sm:$0xff]  ;;  %v4532_v4 = vld [vmem:[#allocation13_spill] sm:$0xff] }
 0x118   : > { %4517 = vst [vmem:[#allocation42_spill] sm:$0xff] %v3048_v33  ;;  %4518 = vst [vmem:[#allocation43_spill] sm:$0xff] %v3050_v3  ;;  %v562_v55 = vadd.f32 %v554_v44, %v2920_v18  ;;  %v3083_v35 = vadd.f32 %v559_v50, %v482_v61  ;;  %v3085_v40 = vadd.f32 %v555_v46, %v478_v49  ;;  %v4524_v62 = vmov 0  ;;  %v4527_v18 = vld [vmem:[#allocation6_spill] sm:$0xff] }
 0x119   : > { %v3087_v36 = vadd.f32 %v557_v42, %v480_v11  ;;  %v3089_v59 = vadd.f32 %v560_v10, %v483_v7  ;;  %v4523_v52 = vrot.slane %v2750_v15, %v2722_v58  ;;  %v643_v34 = vmul.f32 %v2544_v41, %v625_v20  ;;  %v4530_v7 = vld [vmem:[#allocation12_spill] sm:$0xff]  ;;  %v4545_v20 = vld [vmem:[#allocation18_spill] sm:$0xff] }
 0x11a   : > { %v639_v61 = vmul.f32 %v4527_v18, %v621_v45  ;;  %vm4529_vm3 = vcmp.lt.s32.totalorder %v2714_v31, 15  ;;  %v561_v42 = vadd.f32 %v553_v37, %v476_v5  ;;  %v564_v49 = vadd.f32 %v556_v39, %v479_v24  ;;  %v4541_v37 = vld [vmem:[#allocation19_spill] sm:$0xff]  ;;  %v4542_v39 = vld [vmem:[#allocation17_spill] sm:$0xff] }
 0x11b   : > { %v3079_v54 = vpop.permute.xlu1 %826  ;;  %v3081_v28 = vpop.permute.xlu0 %824  ;;  %vm3094_vm7 = vcmp.eq.s32.totalorder %v4523_v52, 1  ;;  %v589_v11 = vsel %vm4529_vm3, %v2658_v16, %v4528_v56  ;;  %vm4531_vm1 = vmmov %vm4529_vm3  ;;  %v4535_v16 = vrot.slane %v2750_v15, %v2724_v8  ;;  %v4536_v51 = vmov 0  ;;  %v4544_v15 = vld [vmem:[#allocation20_spill] sm:$0xff]  ;;  %v4547_v5 = vld [vmem:[#allocation29_spill] sm:$0xff] }
 0x11c   : > { %v4525_v62 = vsel %vm3094_vm7, 4294967295, %v4524_v62  ;;  %v588_v10 = vsel %vm4531_vm1, %v2660_v25, %v4530_v7  ;;  %vm4533_vm2 = vmmov %vm4531_vm1  ;;  %v4538_v25 = vld [vmem:[#allocation14_spill] sm:$0xff]  ;;  %v4548_v24 = vrot.slane %v4547_v5, %v2722_v58  ;;  %v4549_v52 = vmov 0 }
 0x11d   : > { %4526 = vst [vmem:[#allocation45_spill] sm:$0xff] %v4525_v62  ;;  %v587_v48 = vsel %vm4533_vm2, %v4528_v56, %v4532_v4  ;;  %vm4534_vm0 = vmmov %vm4531_vm1  ;;  %vm3120_vm3 = vcmp.eq.s32.totalorder %v4535_v16, 1  ;;  %v4551_v16 = vld [vmem:[#allocation21_spill] sm:$0xff]  ;;  %v651_v32 = vadd.f32 %v643_v34, %v566_v38  ;;  %v647_v1 = vadd.f32 %v639_v61, %v562_v55 }
 0x11e   : > { %v593_v44 = vsel %vm4534_vm0, %v4532_v4, %v2648_v12  ;;  %v4537_v51 = vsel %vm3120_vm3, 4294967295, %v4536_v51  ;;  %vm4539_vm1 = vmmov %vm4534_vm0  ;;  %vm3143_vm13 = vcmp.eq.s32.totalorder %v4548_v24, 1  ;;  %v622_v4 = vsel %vm3007_vm8, %v588_v10, 0.0 }
 0x11f   : > { %v586_v50 = vsel %vm4539_vm1, %v4530_v7, %v4538_v25  ;;  %vm4540_vm2 = vmmov %vm4534_vm0  ;;  %vm4543_vm0 = vcmp.lt.s32.totalorder %v2714_v31, 1  ;;  %v4550_v52 = vsel %vm3143_vm13, 4294967295, %v4549_v52  ;;  %v3147_v56 = vpop.permute.xlu1 %830  ;;  %v626_v7 = vsel %vm3007_vm8, %v589_v11, 0.0 }
 0x120   : > { %v592_v46 = vsel %vm4540_vm2, %v4538_v25, %v2650_v13  ;;  %v676_v12 = vsel %vm4543_vm0, %v4542_v39, %v4541_v37  ;;  %vm4546_vm15 = vmmov %vm4543_vm0  ;;  %v3149_v13 = vpop.permute.xlu0 %828  ;;  %v624_v57 = vsel %vm3018_vm12, %v593_v44, 0.0  ;;  %v627_v11 = vsel %vm3025_vm14, %v587_v48, 0.0 }
 0x121   : > { %v675_v45 = vsel %vm4546_vm15, %v4545_v20, %v4544_v15  ;;  %vm4552_vm15 = vmmov %vm4543_vm0  ;;  %v620_v10 = vsel %vm3018_vm12, %v592_v46, 0.0  ;;  %v623_v21 = vsel %vm3025_vm14, %v586_v50, 0.0  ;;  %v644_v38 = vmul.f32 %v2544_v41, %v626_v7  ;;  %v4557_v7 = vld [vmem:[#allocation25_spill] sm:$0xff] }
 0x122   : > { %v674_v25 = vsel %vm4552_vm15, %v4541_v37, %v4551_v16  ;;  %vm4554_vm1 = vmmov %vm4543_vm0  ;;  %v710_v37 = vsel %vm3044_vm9, %v676_v12, 0.0  ;;  %v640_v55 = vmul.f32 %v4527_v18, %v622_v4  ;;  %v642_v50 = vmul.f32 %v2544_v41, %v624_v57  ;;  %v4555_v12 = vld [vmem:[#allocation24_spill] sm:$0xff] }
 0x123   : > { %v673_v24 = vsel %vm4554_vm1, %v4544_v15, %v4553_v47  ;;  %v706_v15 = vsel %vm3044_vm9, %v675_v45, 0.0  ;;  %v711_v34 = vsel %vm3059_vm4, %v674_v25, 0.0  ;;  %v3181_v48 = vpop.permute.xlu1 %834  ;;  %v645_v46 = vmul.f32 %v2544_v41, %v627_v11  ;;  %vm4556_vm2 = vmmov %vm4543_vm0  ;;  %v4561_v11 = vld [vmem:[#allocation7_spill] sm:$0xff] }
 0x124   : > { %v707_v61 = vsel %vm3059_vm4, %v673_v24, 0.0  ;;  %v3183_v44 = vpop.permute.xlu0 %832  ;;  %v678_v45 = vsel %vm4556_vm2, %v4555_v12, %v4542_v39  ;;  %v677_v4 = vsel %vm4543_vm0, %v4557_v7, %v4545_v20  ;;  %v4558_v25 = vrot.slane %v4547_v5, %v2702_v6  ;;  %vm4569_vm9 = vmmov %vm4554_vm1 }
 0x125   : > { %v4559_v24 = vmov 0  ;;  %v638_v41 = vmul.f32 %v4527_v18, %v620_v10  ;;  %v641_v57 = vmul.f32 %v4527_v18, %v623_v21  ;;  %v728_v39 = vmul.f32 %v4561_v11, %v710_v37 }
 0x126   : > { %vm3198_vm15 = vcmp.eq.s32.totalorder %v4558_v25, 1  ;;  %v724_v53 = vmul.f32 %v4562_v60, %v706_v15  ;;  %v4563_v20 = vrot.slane %v4547_v5, %v2704_v9  ;;  %v4564_v0 = vmov 0 }
 0x127   : > { %v4560_v24 = vsel %vm3198_vm15, 4294967295, %v4559_v24  ;;  %v4566_v25 = vrot.slane %v4547_v5, %v2724_v8  ;;  %v4567_v27 = vmov 0  ;;  %v729_v21 = vmul.f32 %v4561_v11, %v711_v34 }
 0x128   : > { %vm3210_vm2 = vcmp.eq.s32.totalorder %v4563_v20, 1  ;;  %v725_v18 = vmul.f32 %v4562_v60, %v707_v61  ;;  %v672_v10 = vsel %vm4554_vm1, %v4551_v16, %v4555_v12  ;;  %v671_v37 = vsel %vm4569_vm9, %v4553_v47, %v4557_v7  ;;  %v3250_v12 = vpop.permute.xlu1 %838 }
 0x129   : > { %v4565_v0 = vsel %vm3210_vm2, 4294967295, %v4564_v0  ;;  %vm3217_vm0 = vcmp.eq.s32.totalorder %v4566_v25, 1  ;;  %v709_v5 = vsel %vm3094_vm7, %v678_v45, 0.0  ;;  %v705_v15 = vsel %vm3094_vm7, %v677_v4, 0.0  ;;  %v3252_v45 = vpop.permute.xlu0 %836 }
 0x12a   : > { %v4568_v27 = vsel %vm3217_vm0, 4294967295, %v4567_v27  ;;  %vm4570_vm4 = vcmp.lt.s32.totalorder %v2714_v31, 127  ;;  %v4572_v61 = vrot.slane %v2777_v26, %v2722_v58  ;;  %v4573_v47 = vmov 0  ;;  %4575 = vst [vmem:[#allocation6_spill] sm:$0xff] %v3252_v45 }
 0x12b   : > { %v761_v34 = vsel %vm4570_vm4, %v2815_v29, %v2882_v30  ;;  %vm4571_vm1 = vmmov %vm4570_vm4  ;;  %v652_v7 = vadd.f32 %v644_v38, %v3083_v35  ;;  %v648_v4 = vadd.f32 %v640_v55, %v3085_v40  ;;  %v650_v20 = vadd.f32 %v642_v50, %v3087_v36 }
 0x12c   : > { %v760_v16 = vsel %vm4571_vm1, %v2817_v2, %v2884_v14  ;;  %vm3246_vm9 = vcmp.eq.s32.totalorder %v4572_v61, 1  ;;  %v653_v25 = vadd.f32 %v645_v46, %v3089_v59  ;;  %v646_v62 = vadd.f32 %v638_v41, %v561_v42  ;;  %v3277_v50 = vpop.permute.xlu1 %911  ;;  %vm4592_vm14 = vmmov %vm4571_vm1 }
 0x12d   : > { %v4574_v47 = vsel %vm3246_vm9, 4294967295, %v4573_v47  ;;  %v649_v3 = vadd.f32 %v641_v57, %v564_v49  ;;  %v712_v61 = vsel %vm3120_vm3, %v672_v10, 0.0  ;;  %v708_v33 = vsel %vm3120_vm3, %v671_v37, 0.0  ;;  %v3279_v46 = vpop.permute.xlu0 %909 }
 0x12e   : > { %v727_v17 = vmul.f32 %v4561_v11, %v709_v5  ;;  %v723_v45 = vmul.f32 %v4562_v60, %v705_v15  ;;  %v794_v35 = vsel %vm3143_vm13, %v761_v34, 0.0  ;;  %v790_v40 = vsel %vm3143_vm13, %v760_v16, 0.0  ;;  %vm4580_vm13 = vmmov %vm4571_vm1 }
 0x12f   : > { %v736_v36 = vadd.f32 %v728_v39, %v651_v32  ;;  %v732_v59 = vadd.f32 %v724_v53, %v647_v1  ;;  %v737_v42 = vadd.f32 %v729_v21, %v652_v7  ;;  %v3268_v49 = vadd.f32 %v725_v18, %v648_v4 }
 0x130   : > { %v4576_v38 = vrot.slane %v2777_v26, %v2702_v6  ;;  %v4577_v55 = vmov 0  ;;  %v730_v41 = vmul.f32 %v4561_v11, %v712_v61  ;;  %v726_v57 = vmul.f32 %v4562_v60, %v708_v33  ;;  %v4585_v11 = vld [vmem:[#allocation9_spill] sm:$0xff]  ;;  %v4586_v60 = vld [vmem:[#allocation10_spill] sm:$0xff] }
 0x131   : > { %v759_v32 = vsel %vm4571_vm1, %v2882_v30, %v2929_v19  ;;  %v758_v1 = vsel %vm4580_vm13, %v2884_v14, %v2931_v43  ;;  %v4581_v53 = vrot.slane %v2777_v26, %v2724_v8  ;;  %v4582_v39 = vmov 0  ;;  %vm4587_vm13 = vmmov %vm4571_vm1 }
 0x132   : > { %vm3273_vm4 = vcmp.eq.s32.totalorder %v4576_v38, 1  ;;  %v812_v21 = vmul.f32 %v4585_v11, %v794_v35  ;;  %v808_v33 = vmul.f32 %v4586_v60, %v790_v40  ;;  %v757_v30 = vsel %vm4571_vm1, %v2929_v19, %v2981_v23 }
 0x133   : > { %v4578_v55 = vsel %vm3273_vm4, 4294967295, %v4577_v55  ;;  %vm3294_vm3 = vcmp.eq.s32.totalorder %v4581_v53, 1  ;;  %v763_v14 = vsel %vm4587_vm13, %v2981_v23, %v2815_v29  ;;  %v4588_v18 = vrot.slane %v2777_v26, %v2704_v9  ;;  %v916_v23 = vpop.permute.xlu1 %915 }
 0x134   : > { %4579 = vst [vmem:[#allocation11_spill] sm:$0xff] %v4578_v55  ;;  %v4583_v39 = vsel %vm3294_vm3, 4294967295, %v4582_v39  ;;  %v4589_v10 = vmov 0  ;;  %v735_v37 = vadd.f32 %v727_v17, %v650_v20  ;;  %v731_v5 = vadd.f32 %v723_v45, %v646_v62 }
 0x135   : > { %4584 = vst [vmem:[#allocation12_spill] sm:$0xff] %v4583_v39  ;;  %vm3311_vm7 = vcmp.eq.s32.totalorder %v4588_v18, 1  ;;  %v756_v15 = vsel %vm4592_vm14, %v2931_v43, %v2983_v63  ;;  %v762_v19 = vsel %vm4571_vm1, %v2983_v63, %v2817_v2  ;;  %v795_v29 = vsel %vm3198_vm15, %v759_v32, 0.0  ;;  %v914_v2 = vpop.permute.xlu0 %913 }
 0x136   : > { %v4590_v10 = vsel %vm3311_vm7, 4294967295, %v4589_v10  ;;  %v791_v26 = vsel %vm3198_vm15, %v758_v1, 0.0  ;;  %vm4593_vm13 = vcmp.lt.s32.totalorder %v2714_v31, 113  ;;  %v738_v63 = vadd.f32 %v730_v41, %v653_v25 }
 0x137   : > { %4591 = vst [vmem:[#allocation13_spill] sm:$0xff] %v4590_v10  ;;  %v846_v17 = vsel %vm4593_vm13, %v3079_v54, %v3147_v56  ;;  %vm4594_vm14 = vmmov %vm4593_vm13  ;;  %v734_v62 = vadd.f32 %v726_v57, %v649_v3  ;;  %v796_v34 = vsel %vm3210_vm2, %v757_v30, 0.0  ;;  %v797_v16 = vsel %vm3217_vm0, %v763_v14, 0.0 }
 0x138   : > { %v845_v43 = vsel %vm4594_vm14, %v3081_v28, %v3149_v13  ;;  %v820_v45 = vadd.f32 %v812_v21, %v735_v37  ;;  %v816_v7 = vadd.f32 %v808_v33, %v731_v5  ;;  %v792_v4 = vsel %vm3210_vm2, %v756_v15, 0.0  ;;  %vm4599_vm14 = vmmov %vm4593_vm13  ;;  %v920_v33 = vpop.permute.xlu1 %919 }
 0x139   : > { %v793_v20 = vsel %vm3217_vm0, %v762_v19, 0.0  ;;  %v813_v61 = vmul.f32 %v4585_v11, %v795_v29  ;;  %v809_v35 = vmul.f32 %v4586_v60, %v791_v26  ;;  %v879_v3 = vsel %vm3246_vm9, %v846_v17, 0.0  ;;  %v918_v30 = vpop.permute.xlu0 %917  ;;  %v4615_v29 = vld [vmem:[#allocation16_spill] sm:$0xff] }
 0x13a   : > { %v875_v25 = vsel %vm3246_vm9, %v845_v43, 0.0  ;;  %v4595_v40 = vrot.slane %v2870_v22, %v2722_v58  ;;  %v4596_v38 = vmov 0  ;;  %v814_v41 = vmul.f32 %v4585_v11, %v796_v34 }
 0x13b   : > { %v815_v57 = vmul.f32 %v4585_v11, %v797_v16  ;;  %v844_v32 = vsel %vm4593_vm13, %v3147_v56, %v3181_v48  ;;  %v843_v1 = vsel %vm4599_vm14, %v3149_v13, %v3183_v44  ;;  %v4600_v53 = vrot.slane %v2870_v22, %v2702_v6  ;;  %v4604_v13 = vld [vmem:[#allocation6_spill] sm:$0xff]  ;;  %vm4605_vm14 = vmmov %vm4593_vm13 }
 0x13c   : > { %vm3353_vm1 = vcmp.eq.s32.totalorder %v4595_v40, 1  ;;  %v4601_v21 = vmov 0  ;;  %v810_v11 = vmul.f32 %v4586_v60, %v792_v4  ;;  %v811_v14 = vmul.f32 %v4586_v60, %v793_v20  ;;  %v4617_v4 = vld [vmem:[#allocation36_spill] sm:$0xff] }
 0x13d   : > { %v4597_v38 = vsel %vm3353_vm1, 4294967295, %v4596_v38  ;;  %vm3370_vm12 = vcmp.eq.s32.totalorder %v4600_v53, 1  ;;  %v848_v56 = vsel %vm4593_vm13, %v3250_v12, %v3079_v54  ;;  %v847_v18 = vsel %vm4605_vm14, %v4604_v13, %v3081_v28  ;;  %v4614_v54 = vld [vmem:[#allocation15_spill] sm:$0xff]  ;;  %vm4616_vm14 = vmmov %vm4593_vm13 }
 0x13e   : > { %4598 = vst [vmem:[#allocation14_spill] sm:$0xff] %v4597_v38  ;;  %v4602_v21 = vsel %vm3370_vm12, 4294967295, %v4601_v21  ;;  %v4606_v37 = vrot.slane %v2870_v22, %v2704_v9  ;;  %v4607_v5 = vmov 0  ;;  %v4610_v60 = vrot.slane %v2870_v22, %v2724_v8 }
 0x13f   : > { %4603 = vst [vmem:[#allocation19_spill] sm:$0xff] %v4602_v21  ;;  %v4611_v15 = vmov 0  ;;  %v897_v19 = vmul.f32 %v4614_v54, %v879_v3  ;;  %v893_v26 = vmul.f32 %v4615_v29, %v875_v25  ;;  %v842_v28 = vsel %vm4593_vm13, %v3181_v48, %v3250_v12 }
 0x140   : > { %vm3387_vm9 = vcmp.eq.s32.totalorder %v4606_v37, 1  ;;  %vm3394_vm0 = vcmp.eq.s32.totalorder %v4610_v60, 1  ;;  %v841_v17 = vsel %vm4616_vm14, %v3183_v44, %v4604_v13  ;;  %v821_v22 = vadd.f32 %v813_v61, %v736_v36  ;;  %v922_v61 = vpop.permute.xlu0 %921 }
 0x141   : > { %v4608_v5 = vsel %vm3387_vm9, 4294967295, %v4607_v5  ;;  %v4612_v15 = vsel %vm3394_vm0, 4294967295, %v4611_v15  ;;  %v817_v43 = vadd.f32 %v809_v35, %v732_v59  ;;  %v880_v34 = vsel %vm3273_vm4, %v844_v32, 0.0  ;;  %v924_v59 = vpop.permute.xlu1 %923 }
 0x142   : > { %4609 = vst [vmem:[#allocation17_spill] sm:$0xff] %v4608_v5  ;;  %4613 = vst [vmem:[#allocation20_spill] sm:$0xff] %v4612_v15  ;;  %v876_v16 = vsel %vm3273_vm4, %v843_v1, 0.0  ;;  %v4618_v20 = vrot.slane %v4617_v4, %v2722_v58  ;;  %v4619_v48 = vmov 0  ;;  %v822_v12 = vadd.f32 %v814_v41, %v737_v42 }
 0x143   : > { %v823_v3 = vadd.f32 %v815_v57, %v738_v63  ;;  %v882_v44 = vsel %vm3294_vm3, %v848_v56, 0.0  ;;  %v878_v36 = vsel %vm3294_vm3, %v847_v18, 0.0  ;;  %v818_v35 = vadd.f32 %v810_v11, %v3268_v49 }
 0x144   : > { %vm3416_vm15 = vcmp.eq.s32.totalorder %v4618_v20, 1  ;;  %v819_v25 = vadd.f32 %v811_v14, %v734_v62  ;;  %v881_v58 = vsel %vm3311_vm7, %v842_v28, 0.0  ;;  %v877_v40 = vsel %vm3311_vm7, %v841_v17, 0.0  ;;  %v995_v18 = vpop.permute.xlu0 %994 }
 0x145   : > { %v4620_v48 = vsel %vm3416_vm15, 4294967295, %v4619_v48  ;;  %v898_v42 = vmul.f32 %v4614_v54, %v880_v34  ;;  %v894_v63 = vmul.f32 %v4615_v29, %v876_v16  ;;  %v901_v41 = vadd.f32 %v893_v26, %v816_v7  ;;  %v997_v13 = vpop.permute.xlu1 %996 }
 0x146   : > { %4621 = vst [vmem:[#allocation18_spill] sm:$0xff] %v4620_v48  ;;  %v905_v57 = vadd.f32 %v897_v19, %v820_v45  ;;  %v900_v32 = vmul.f32 %v4614_v54, %v882_v44  ;;  %v896_v1 = vmul.f32 %v4615_v29, %v878_v36  ;;  %vm4622_vm13 = vcmp.lt.s32.totalorder %v2714_v31, 112  ;;  %v4643_v36 = vld [vmem:[#allocation28_spill] sm:$0xff] }
 0x147   : > { %v931_v49 = vsel %vm4622_vm13, %v3277_v50, %v916_v23  ;;  %vm4623_vm14 = vmmov %vm4622_vm13  ;;  %v4624_v53 = vrot.slane %v4617_v4, %v2702_v6  ;;  %v4625_v11 = vmov 0  ;;  %v899_v45 = vmul.f32 %v4614_v54, %v881_v58 }
 0x148   : > { %v930_v62 = vsel %vm4623_vm14, %v3279_v46, %v914_v2  ;;  %v895_v7 = vmul.f32 %v4615_v29, %v877_v40  ;;  %vm4628_vm3 = vmmov %vm4622_vm13  ;;  %v902_v19 = vadd.f32 %v894_v63, %v817_v43  ;;  %v906_v29 = vadd.f32 %v898_v42, %v821_v22 }
 0x149   : > { %vm3442_vm2 = vcmp.eq.s32.totalorder %v4624_v53, 1  ;;  %v929_v14 = vsel %vm4628_vm3, %v916_v23, %v920_v33  ;;  %vm4629_vm13 = vmmov %vm4628_vm3  ;;  %v964_v23 = vsel %vm3353_vm1, %v931_v49, 0.0  ;;  %v4635_v26 = vmov 0  ;;  %v1001_v20 = vpop.permute.xlu1 %1000 }
 0x14a   : > { %v4626_v11 = vsel %vm3442_vm2, 4294967295, %v4625_v11  ;;  %v928_v56 = vsel %vm4629_vm13, %v914_v2, %v918_v30  ;;  %vm4630_vm14 = vmmov %vm4628_vm3  ;;  %v960_v2 = vsel %vm3353_vm1, %v930_v62, 0.0  ;;  %v4639_v28 = vmov 0  ;;  %v4646_v62 = vld [vmem:[#allocation42_spill] sm:$0xff] }
 0x14b   : > { %4627 = vst [vmem:[#allocation29_spill] sm:$0xff] %v4626_v11  ;;  %v927_v37 = vsel %vm4630_vm14, %v920_v33, %v924_v59  ;;  %vm4631_vm7 = vmmov %vm4628_vm3  ;;  %v965_v33 = vsel %vm3370_vm12, %v929_v14, 0.0  ;;  %v904_v17 = vadd.f32 %v896_v1, %v819_v25  ;;  %v908_v22 = vadd.f32 %v900_v32, %v823_v3  ;;  %v4647_v14 = vld [vmem:[#allocation43_spill] sm:$0xff] }
 0x14c   : > { %v933_v6 = vsel %vm4631_vm7, %v924_v59, %v3277_v50  ;;  %vm4632_vm4 = vmmov %vm4628_vm3  ;;  %v961_v50 = vsel %vm3370_vm12, %v928_v56, 0.0  ;;  %v966_v43 = vsel %vm3387_vm9, %v927_v37, 0.0  ;;  %v978_v59 = vmul.f32 %v4643_v36, %v960_v2 }
 0x14d   : > { %v926_v60 = vsel %vm4632_vm4, %v918_v30, %v922_v61  ;;  %vm4633_vm8 = vmmov %vm4628_vm3  ;;  %v4634_v30 = vrot.slane %v4617_v4, %v2704_v9  ;;  %v967_v34 = vsel %vm3394_vm0, %v933_v6, 0.0  ;;  %vm4644_vm3 = vcmp.lt.s32.totalorder %v2714_v31, 111  ;;  %v1005_v37 = vpop.permute.xlu1 %1004 }
 0x14e   : > { %v932_v54 = vsel %vm4633_vm8, %v922_v61, %v3279_v46  ;;  %v4638_v46 = vrot.slane %v4617_v4, %v2724_v8  ;;  %v962_v9 = vsel %vm3387_vm9, %v926_v60, 0.0  ;;  %v999_v8 = vpop.permute.xlu0 %998  ;;  %v4642_v4 = vld [vmem:[#allocation27_spill] sm:$0xff]  ;;  %v1016_v3 = vsel %vm4644_vm3, %v997_v13, %v1001_v20  ;;  %vm4645_vm4 = vmmov %vm4644_vm3 }
 0x14f   : > { %vm3473_vm7 = vcmp.eq.s32.totalorder %v4634_v30, 1  ;;  %v963_v16 = vsel %vm3394_vm0, %v932_v54, 0.0  ;;  %v982_v44 = vmul.f32 %v4642_v4, %v964_v23  ;;  %v1015_v61 = vsel %vm4645_vm4, %v995_v18, %v999_v8  ;;  %vm4648_vm13 = vmmov %vm4644_vm3 }
 0x150   : > { %v4636_v26 = vsel %vm3473_vm7, 4294967295, %v4635_v26  ;;  %vm3480_vm8 = vcmp.eq.s32.totalorder %v4638_v46, 1  ;;  %v983_v25 = vmul.f32 %v4642_v4, %v965_v33  ;;  %v979_v58 = vmul.f32 %v4643_v36, %v961_v50  ;;  %vm4649_vm14 = vmmov %vm4644_vm3 }
 0x151   : > { %4637 = vst [vmem:[#allocation21_spill] sm:$0xff] %v4636_v26  ;;  %v4640_v28 = vsel %vm3480_vm8, 4294967295, %v4639_v28  ;;  %v1049_v40 = vsel %vm3416_vm15, %v1016_v3, 0.0  ;;  %v1045_v42 = vsel %vm3416_vm15, %v1015_v61, 0.0  ;;  %v984_v63 = vmul.f32 %v4642_v4, %v966_v43  ;;  %vm4650_vm4 = vmmov %vm4644_vm3 }
 0x152   : > { %4641 = vst [vmem:[#allocation22_spill] sm:$0xff] %v4640_v28  ;;  %v985_v32 = vmul.f32 %v4642_v4, %v967_v34  ;;  %v980_v1 = vmul.f32 %v4643_v36, %v962_v9  ;;  %v981_v49 = vmul.f32 %v4643_v36, %v963_v16  ;;  %v1067_v53 = vmul.f32 %v4646_v62, %v1049_v40  ;;  %v1003_v6 = vpop.permute.xlu0 %1002 }
 0x153   : > { %v1063_v56 = vmul.f32 %v4647_v14, %v1045_v42  ;;  %v903_v60 = vadd.f32 %v895_v7, %v818_v35  ;;  %v907_v54 = vadd.f32 %v899_v45, %v822_v12  ;;  %v1014_v23 = vsel %vm4648_vm13, %v1001_v20, %v1005_v37  ;;  %v1009_v20 = vpop.permute.xlu1 %1008  ;;  %vm4651_vm13 = vmmov %vm4644_vm3 }
 0x154   : > { %v1013_v2 = vsel %vm4649_vm14, %v999_v8, %v1003_v6  ;;  %v986_v33 = vadd.f32 %v978_v59, %v901_v41  ;;  %v990_v50 = vadd.f32 %v982_v44, %v905_v57  ;;  %v1050_v30 = vsel %vm3442_vm2, %v1014_v23, 0.0  ;;  %vm4652_vm14 = vmmov %vm4644_vm3 }
 0x155   : > { %v1046_v46 = vsel %vm3442_vm2, %v1013_v2, 0.0  ;;  %v987_v43 = vadd.f32 %v979_v58, %v902_v19  ;;  %v991_v34 = vadd.f32 %v983_v25, %v906_v29  ;;  %v989_v9 = vadd.f32 %v981_v49, %v904_v17 }
 0x156   : > { %v993_v16 = vadd.f32 %v985_v32, %v908_v22  ;;  %v988_v35 = vadd.f32 %v980_v1, %v903_v60  ;;  %v992_v12 = vadd.f32 %v984_v63, %v907_v54  ;;  %v1068_v45 = vmul.f32 %v4646_v62, %v1050_v30  ;;  %v1007_v8 = vpop.permute.xlu0 %1006 }
 0x157   : > { %v1064_v7 = vmul.f32 %v4647_v14, %v1046_v46  ;;  %v1071_v41 = vadd.f32 %v1063_v56, %v986_v33  ;;  %v1075_v57 = vadd.f32 %v1067_v53, %v990_v50  ;;  %v1012_v4 = vsel %vm4644_vm3, %v1005_v37, %v1009_v20  ;;  %v2144_v37 = vld [vmem:[%s4281_s3] sm:$0xff]  }
 0x158   : > { %v1018_v44 = vsel %vm4650_vm4, %v1009_v20, %v997_v13  ;;  %v1011_v19 = vsel %vm4651_vm13, %v1003_v6, %v1007_v8  ;;  %v1017_v29 = vsel %vm4652_vm14, %v1007_v8, %v995_v18  ;;  %v1051_v17 = vsel %vm3473_vm7, %v1012_v4, 0.0 }
 0x159   : > { %v1052_v22 = vsel %vm3480_vm8, %v1018_v44, 0.0  ;;  %v1047_v36 = vsel %vm3473_vm7, %v1011_v19, 0.0  ;;  %v1048_v59 = vsel %vm3480_vm8, %v1017_v29, 0.0  ;;  %v1069_v13 = vmul.f32 %v4646_v62, %v1051_v17 }
 0x15a   : > { %v1070_v3 = vmul.f32 %v4646_v62, %v1052_v22  ;;  %v1065_v61 = vmul.f32 %v4647_v14, %v1047_v36  ;;  %v1066_v18 = vmul.f32 %v4647_v14, %v1048_v59  ;;  %v1072_v25 = vadd.f32 %v1064_v7, %v987_v43  ;;  %v1095_v14 = vpop.permute.xlu1 %1094  ;;  %v1090_v6 = vpop.permute.xlu0 %1089 }
 0x15b   : > { %v1076_v58 = vadd.f32 %v1068_v45, %v991_v34  ;;  %v1077_v32 = vadd.f32 %v1069_v13, %v992_v12  ;;  %v1081_v49 = vpack.c.bf16 %v1075_v57, %v1071_v41  ;;  %vm1102_vm3 = vcmask 130048  }
 0x15c   : > { %v1074_v40 = vadd.f32 %v1066_v18, %v989_v9  ;;  %v1078_v42 = vadd.f32 %v1070_v3, %v993_v16  ;;  %v1073_v63 = vadd.f32 %v1065_v61, %v988_v35  ;;  %v4653_v62 = vmov 0  }
 0x15d   : > { %v1082_v1 = vpack.c.bf16 %v1076_v58, %v1072_v25  ;;  %vm4675_vm4 = vcmp.lt.s32.totalorder %v2714_v31, 17 }
 0x15e   : > { %v1084_v53 = vpack.c.bf16 %v1078_v42, %v1074_v40  ;;  %v1083_v56 = vpack.c.bf16 %v1077_v32, %v1073_v63  ;;  %v3617_v41 = vpop.permute.xlu0 %1205  ;;  %v3623_v44 = vpop.permute.xlu1 %1210  ;;  %vm4676_vm13 = vmmov %vm4675_vm4 }
 0x15f   : > { %1106 = vmatprep.subr.bf16.mxu0 %v1082_v1  ;;  %vm4679_vm14 = vmmov %vm4675_vm4 }
 0x160   : > { %1107 = vmatpush1.bf16.msra.mxu0 %v1081_v49  ;;  %1149 = vmatprep.subr.bf16.mxu1 %v1084_v53 }
 0x161   : > { %1150 = vmatpush1.bf16.msra.mxu1 %v1083_v56 }
 0x162   : > { %v3633_v22 = vpop.permute.xlu0 %1257  ;;  %v3639_v59 = vpop.permute.xlu1 %1262 }
 0x163   : > { %2060 = vmatmul.mubr.msk.bf16.vlgmr.msra.gmra.mrb[0].mxu0 %vm1102_vm3, %v2144_v37 }
 0x164   : > { %2061 = vmatmul.mubr.msk.bf16.vlgmr.msra.gmra.mrb[0].mxu1 %vm1102_vm3, %v2144_v37  ;;  %1766 = vmatprep.mubr.bf16.mxu0 %v4653_v62 }
 0x165   : > { %1809 = vmatprep.mubr.bf16.mxu1 %v4653_v62 }
 0x166   : > { %v3645_v13 = vpop.permute.xlu0 %1318  ;;  %v3649_v3 = vpop.permute.xlu1 %1323 }
 0x16a   : > { %v3655_v61 = vpop.permute.xlu0 %1379  ;;  %v3659_v18 = vpop.permute.xlu1 %1384 }
 0x16e   : > { %v3665_v25 = vpop.permute.xlu0 %1440  ;;  %v3669_v58 = vpop.permute.xlu1 %1445 }
 0x172   : > { %v3675_v40 = vpop.permute.xlu0 %1501  ;;  %v3679_v42 = vpop.permute.xlu1 %1506 }
 0x176   : > { %v3685_v63 = vpop.permute.xlu0 %1562  ;;  %v3689_v32 = vpop.permute.xlu1 %1567 }
 0x177   : > { %4659 = vst [vmem:[#allocation24_spill] sm:$0xff] %v3685_v63  ;;  %4660 = vst [vmem:[#allocation25_spill] sm:$0xff] %v3689_v32 }
 0x17a   : > { %v3695_v1 = vpop.permute.xlu0 %1623  ;;  %v3699_v49 = vpop.permute.xlu1 %1628 }
 0x17b   : > { %4661 = vst [vmem:[#allocation7_spill] sm:$0xff] %v3695_v1  ;;  %4662 = vst [vmem:[#allocation8_spill] sm:$0xff] %v3699_v49 }
 0x17e   : > { %v3705_v53 = vpop.permute.xlu0 %1684  ;;  %v3709_v56 = vpop.permute.xlu1 %1689 }
 0x17f   : > { %4663 = vst [vmem:[#allocation9_spill] sm:$0xff] %v3705_v53  ;;  %4664 = vst [vmem:[#allocation10_spill] sm:$0xff] %v3709_v56 }
 0x236   : > { %v1140_v60 = vpop.f32.mrb[0].mxu0 }
 0x237   : > { %v1141_v54 = vadd.f32 %v1140_v60, %v1090_v6  ;;  %v1142_v23 = vpop.f32.mrb[1].mxu0  ;;  %v1183_v2 = vpop.f32.mrb[0].mxu1 }
 0x238   : > { %v1144_v33 = vpop.f32.mrb[2].mxu0  ;;  %v1184_v50 = vadd.f32 %v1183_v2, %v1090_v6  ;;  %v1185_v30 = vpop.f32.mrb[1].mxu1  ;;  %v1143_v20 = vadd.f32 %v1142_v23, %v1090_v6  ;;  %v1714_v2 = vld [vmem:[%s4285_s7] sm:$0xff] }
 0x239   : > { %v3547_v46 = vmax.f32 %v1141_v54, 0.0  ;;  %v1145_v43 = vadd.f32 %v1144_v33, %v1095_v14  ;;  %v1146_v34 = vpop.f32.mrb[3].mxu0  ;;  %v1187_v9 = vpop.f32.mrb[2].mxu1  ;;  %v1186_v4 = vadd.f32 %v1185_v30, %v1090_v6 }
 0x23a   : > { %v1188_v16 = vadd.f32 %v1187_v9, %v1095_v14  ;;  %v1189_v35 = vpop.f32.mrb[3].mxu1  ;;  %v3551_v45 = vmax.f32 %v1184_v50, 0.0  ;;  %v1147_v8 = vadd.f32 %v1146_v34, %v1095_v14  ;;  %v3619_v57 = vmax.f32 %v1143_v20, 0.0  ;;  %v1715_v50 = vld [vmem:[%s4285_s7 + $0x8] sm:$0xff] }
 0x23b   : > { %v3549_v12 = vmax.f32 %v1145_v43, 0.0  ;;  %1221 = vrot.lane.b32.xlu0 %v3547_v46, %s2220_s23  ;;  %v1190_v29 = vadd.f32 %v1189_v35, %v1095_v14  ;;  %v3629_v17 = vmax.f32 %v1186_v4, 0.0 }
 0x23c   : > { %v3555_v7 = vmax.f32 %v1188_v16, 0.0  ;;  %v3625_v19 = vmax.f32 %v1147_v8, 0.0 }
 0x23d   : > { %1223 = vrot.lane.b32.xlu1 %v3549_v12, %s2220_s23  ;;  %v3635_v36 = vmax.f32 %v1190_v29, 0.0 }
 0x23f   : > { %1229 = vrot.lane.b32.xlu0 %v3551_v45, %s2220_s23 }
 0x241   : > { %1231 = vrot.lane.b32.xlu1 %v3555_v7, %s2220_s23 }
 0x243   : > { %1281 = vrot.lane.b32.xlu0 %v3547_v46, %s2221_s14 }
 0x245   : > { %1283 = vrot.lane.b32.xlu1 %v3549_v12, %s2221_s14 }
 0x247   : > { %1289 = vrot.lane.b32.xlu0 %v3551_v45, %s2221_s14 }
 0x249   : > { %1291 = vrot.lane.b32.xlu1 %v3555_v7, %s2221_s14 }
 0x24b   : > { %1342 = vrot.lane.b32.xlu0 %v3547_v46, %s2222_s26 }
 0x24d   : > { %1344 = vrot.lane.b32.xlu1 %v3549_v12, %s2222_s26 }
 0x24f   : > { %1350 = vrot.lane.b32.xlu0 %v3551_v45, %s2222_s26 }
 0x251   : > { %1352 = vrot.lane.b32.xlu1 %v3555_v7, %s2222_s26 }
 0x253   : > { %1403 = vrot.lane.b32.xlu0 %v3547_v46, %s4654_s24 }
 0x255   : > { %1405 = vrot.lane.b32.xlu1 %v3549_v12, %s4654_s24 }
 0x257   : > { %1411 = vrot.lane.b32.xlu0 %v3551_v45, %s4654_s24 }
 0x259   : > { %1413 = vrot.lane.b32.xlu1 %v3555_v7, %s4654_s24 }
 0x25b   : > { %1464 = vrot.lane.b32.xlu0 %v3547_v46, %s4655_s21 }
 0x25d   : > { %1466 = vrot.lane.b32.xlu1 %v3549_v12, %s4655_s21 }
 0x25f   : > { %1472 = vrot.lane.b32.xlu0 %v3551_v45, %s4655_s21 }
 0x261   : > { %1474 = vrot.lane.b32.xlu1 %v3555_v7, %s4655_s21 }
 0x263   : > { %1525 = vrot.lane.b32.xlu0 %v3547_v46, %s4656_s17 }
 0x265   : > { %1527 = vrot.lane.b32.xlu1 %v3549_v12, %s4656_s17 }
 0x267   : > { %1533 = vrot.lane.b32.xlu0 %v3551_v45, %s4656_s17 }
 0x269   : > { %1535 = vrot.lane.b32.xlu1 %v3555_v7, %s4656_s17 }
 0x26b   : > { %1586 = vrot.lane.b32.xlu0 %v3547_v46, %s4657_s27 }
 0x26d   : > { %1588 = vrot.lane.b32.xlu1 %v3549_v12, %s4657_s27 }
 0x26f   : > { %1594 = vrot.lane.b32.xlu0 %v3551_v45, %s4657_s27 }
 0x271   : > { %1596 = vrot.lane.b32.xlu1 %v3555_v7, %s4657_s27 }
 0x273   : > { %1647 = vrot.lane.b32.xlu0 %v3547_v46, %s4658_s13 }
 0x275   : > { %1649 = vrot.lane.b32.xlu1 %v3549_v12, %s4658_s13 }
 0x277   : > { %1655 = vrot.lane.b32.xlu0 %v3551_v45, %s4658_s13 }
 0x279   : > { %1657 = vrot.lane.b32.xlu1 %v3555_v7, %s4658_s13 }
 0x27b   : > { %1225 = vrot.lane.b32.xlu0 %v3619_v57, %s2220_s23 }
 0x27d   : > { %1227 = vrot.lane.b32.xlu1 %v3625_v19, %s2220_s23 }
 0x27f   : > { %1233 = vrot.lane.b32.xlu0 %v3629_v17, %s2220_s23 }
 0x281   : > { %1235 = vrot.lane.b32.xlu1 %v3635_v36, %s2220_s23 }
 0x283   : > { %1285 = vrot.lane.b32.xlu0 %v3619_v57, %s2221_s14 }
 0x285   : > { %1287 = vrot.lane.b32.xlu1 %v3625_v19, %s2221_s14 }
 0x287   : > { %1293 = vrot.lane.b32.xlu0 %v3629_v17, %s2221_s14 }
 0x289   : > { %1295 = vrot.lane.b32.xlu1 %v3635_v36, %s2221_s14 }
 0x28b   : > { %1346 = vrot.lane.b32.xlu0 %v3619_v57, %s2222_s26 }
 0x28d   : > { %1348 = vrot.lane.b32.xlu1 %v3625_v19, %s2222_s26 }
 0x28f   : > { %1354 = vrot.lane.b32.xlu0 %v3629_v17, %s2222_s26 }
 0x291   : > { %1356 = vrot.lane.b32.xlu1 %v3635_v36, %s2222_s26 }
 0x293   : > { %1407 = vrot.lane.b32.xlu0 %v3619_v57, %s4654_s24 }
 0x295   : > { %1409 = vrot.lane.b32.xlu1 %v3625_v19, %s4654_s24 }
 0x297   : > { %1415 = vrot.lane.b32.xlu0 %v3629_v17, %s4654_s24 }
 0x299   : > { %1417 = vrot.lane.b32.xlu1 %v3635_v36, %s4654_s24  ;;  %s2228_s24 = smov [#allocation3]  }
 0x29b   : > { %1468 = vrot.lane.b32.xlu0 %v3619_v57, %s4655_s21 }
 0x29d   : > { %1470 = vrot.lane.b32.xlu1 %v3625_v19, %s4655_s21 }
 0x29f   : > { %1476 = vrot.lane.b32.xlu0 %v3629_v17, %s4655_s21 }
 0x2a1   : > { %1478 = vrot.lane.b32.xlu1 %v3635_v36, %s4655_s21  ;;  %s2159_s21 = sshll.u32 %s2228_s24, 4  ;;  %s2160_s21 = int_to_ptr.vmem [resolvable:$false] %s2159_s21 }
 0x2a3   : > { %1529 = vrot.lane.b32.xlu0 %v3619_v57, %s4656_s17 }
 0x2a5   : > { %1531 = vrot.lane.b32.xlu1 %v3625_v19, %s4656_s17 }
 0x2a7   : > { %1537 = vrot.lane.b32.xlu0 %v3629_v17, %s4656_s17 }
 0x2a9   : > { %1539 = vrot.lane.b32.xlu1 %v3635_v36, %s4656_s17  ;;  %s4207_s17 = scalar_lea.vmem [#allocation3], %s2363_s29  ;;  %s4798_s29 = sadd.s32 4294967295, %s2217_s12  }
 0x2ab   : > { %1590 = vrot.lane.b32.xlu0 %v3619_v57, %s4657_s27 }
 0x2ad   : > { %1592 = vrot.lane.b32.xlu1 %v3625_v19, %s4657_s27  ;;  %v3715_v37 = vpop.permute.xlu0 %1221 }
 0x2af   : > { %v3717_v14 = vpop.permute.xlu1 %1223  ;;  %1598 = vrot.lane.b32.xlu0 %v3629_v17, %s4657_s27 }
 0x2b1   : > { %1600 = vrot.lane.b32.xlu1 %v3635_v36, %s4657_s27  ;;  %v1230_v6 = vpop.permute.xlu0 %1229  ;;  %s1966_s27 = sshll.u32 %s4207_s17, 4  ;;  %s4218_s27 = int_to_ptr.vmem [resolvable:$true] %s1966_s27 }
 0x2b2   : > { %s2155_s16 = scalar_lea.vmem %s4218_s27, 1024  ;;  %p2162_p2 = scmp.lt.s32.totalorder %s4218_s27, %s2160_s21 }
 0x2b3   : > { %v3723_v60 = vpop.permute.xlu1 %1231  ;;  %1651 = vrot.lane.b32.xlu0 %v3619_v57, %s4658_s13  ;;  %p2156_p13 = scmp.ne.s32.totalorder %s4218_s27, %s2155_s16 }
 0x2b5   : > { %1653 = vrot.lane.b32.xlu1 %v3625_v19, %s4658_s13  ;;  %v3729_v54 = vpop.permute.xlu0 %1281  ;;  %p2157_p0 = pnand %p2156_p13, %p2320_p6 }
 0x2b7   : > { %v3731_v23 = vpop.permute.xlu1 %1283  ;;  %1659 = vrot.lane.b32.xlu0 %v3629_v17, %s4658_s13  ;;  %p2158_p1 = pneg %p2157_p0 }
 0x2b9   : > { %1661 = vrot.lane.b32.xlu1 %v3635_v36, %s4658_s13  ;;  %v3740_v33 = vpop.permute.xlu0 %1289  ;;  %s2090_s13 = sshll.u32 %s4798_s29, 9  ;;  %s2161_s29 = scalar_lea.vmem %s2160_s21, 2048 }
 0x2ba   : > { %s4228_s26 = scalar_lea.hbm %s4287_s9, %s2090_s13  ;;  %p2163_p3 = scmp.lt.s32.totalorder %s2161_s29, %s2155_s16 }
 0x2bb   : > { %v3745_v30 = vpop.permute.xlu1 %1291  ;;  %1718 = vperm.xlu0 %2142, %v1714_v2  }
 0x2bc   : > { %p2164_p4 = por %p2163_p3, %p2162_p2 }
 0x2bd   : > { %1723 = vperm.xlu1 %2143, %v1715_v50   ;;  %v3747_v43 = vpop.permute.xlu0 %1342 }
 0x2be   : > { %p2165_p5 = pnand %p2164_p4, %p2158_p1 }
 0x2bf   : > { %v3749_v34 = vpop.permute.xlu1 %1344 }
 0x2c1   : > { %v3751_v9 = vpop.permute.xlu0 %1350 }
 0x2c3   : > { %v3753_v16 = vpop.permute.xlu1 %1352 }
 0x2c5   : > { %v3755_v35 = vpop.permute.xlu0 %1403 }
 0x2c7   : > { %v3757_v20 = vpop.permute.xlu1 %1405 }
 0x2c9   : > { %v3759_v8 = vpop.permute.xlu0 %1411 }
 0x2cb   : > { %v3761_v4 = vpop.permute.xlu1 %1413 }
 0x2cd   : > { %v3763_v29 = vpop.permute.xlu0 %1464 }
 0x2cf   : > { %v3765_v2 = vpop.permute.xlu1 %1466 }
 0x2d1   : > { %v3767_v50 = vpop.permute.xlu0 %1472 }
 0x2d3   : > { %v3769_v62 = vpop.permute.xlu1 %1474 }
 0x2d5   : > { %v3771_v28 = vpop.permute.xlu0 %1525 }
 0x2d7   : > { %v3773_v26 = vpop.permute.xlu1 %1527 }
 0x2d8   : > { %4665 = vst [vmem:[#allocation6_spill] sm:$0xff] %v3773_v26 }
 0x2d9   : > { %v3775_v56 = vpop.permute.xlu0 %1533 }
 0x2db   : > { %v3777_v53 = vpop.permute.xlu1 %1535 }
 0x2dc   : > { %4666 = vst [vmem:[#allocation15_spill] sm:$0xff] %v3777_v53  ;;  %v1219_v53 = vmul.f32 %v3623_v44, %v3555_v7  ;;  %v1218_v7 = vmul.f32 %v3623_v44, %v3625_v19 }
 0x2dd   : > { %v3779_v11 = vpop.permute.xlu0 %1586 }
 0x2de   : > { %4667 = vst [vmem:[#allocation16_spill] sm:$0xff] %v3779_v11  ;;  %v1215_v11 = vmul.f32 %v3617_v41, %v3551_v45 }
 0x2df   : > { %v3781_v48 = vpop.permute.xlu1 %1588 }
 0x2e0   : > { %4668 = vst [vmem:[#allocation36_spill] sm:$0xff] %v3781_v48 }
 0x2e1   : > { %v3783_v15 = vpop.permute.xlu0 %1594 }
 0x2e2   : > { %4669 = vst [vmem:[#allocation27_spill] sm:$0xff] %v3783_v15 }
 0x2e3   : > { %v3785_v5 = vpop.permute.xlu1 %1596 }
 0x2e4   : > { %4670 = vst [vmem:[#allocation28_spill] sm:$0xff] %v3785_v5 }
 0x2e5   : > { %v3787_v49 = vpop.permute.xlu0 %1647 }
 0x2e6   : > { %4671 = vst [vmem:[#allocation42_spill] sm:$0xff] %v3787_v49 }
 0x2e7   : > { %v3789_v1 = vpop.permute.xlu1 %1649 }
 0x2e8   : > { %4672 = vst [vmem:[#allocation43_spill] sm:$0xff] %v3789_v1  ;;  %v1213_v1 = vmul.f32 %v3617_v41, %v3547_v46 }
 0x2e9   : > { %v3791_v21 = vpop.permute.xlu0 %1655 }
 0x2ea   : > { %4673 = vst [vmem:[#allocation46_spill] sm:$0xff] %v3791_v21 }
 0x2eb   : > { %v3793_v38 = vpop.permute.xlu1 %1657 }
 0x2ec   : > { %4674 = vst [vmem:[#allocation47_spill] sm:$0xff] %v3793_v38 }
 0x2ed   : > { %v1226_v39 = vpop.permute.xlu0 %1225 }
 0x2ee   : > { %v1239_v10 = vsel %vm4675_vm4, %v1226_v39, %v1230_v6  ;;  %v1241_v48 = vsel %vm4676_vm13, %v3715_v37, %v1226_v39  ;;  %vm4684_vm13 = vmmov %vm4675_vm4 }
 0x2ef   : > { %v1249_v49 = vsel %vm2741_vm6, %v1239_v10, 0.0  ;;  %v1228_v15 = vpop.permute.xlu1 %1227  ;;  %v1248_v38 = vsel %vm2730_vm5, %v1241_v48, 0.0  ;;  %v1214_v10 = vmul.f32 %v3617_v41, %v3619_v57  ;;  %v1216_v48 = vmul.f32 %v3617_v41, %v3629_v17 }
 0x2f0   : > { %v1267_v32 = vmul.f32 %v3633_v22, %v1249_v49  ;;  %v1240_v63 = vsel %vm4679_vm14, %v1228_v15, %v3723_v60  ;;  %v1242_v39 = vsel %vm4675_vm4, %v3717_v14, %v1228_v15  ;;  %v1217_v15 = vmul.f32 %v3623_v44, %v3549_v12  ;;  %vm4685_vm14 = vmmov %vm4675_vm4 }
 0x2f1   : > { %v1252_v45 = vsel %vm2730_vm5, %v1242_v39, 0.0  ;;  %v1253_v46 = vsel %vm2741_vm6, %v1240_v63, 0.0  ;;  %v1234_v49 = vpop.permute.xlu0 %1233  ;;  %v1266_v57 = vmul.f32 %v3633_v22, %v1248_v38  ;;  %vm4680_vm5 = vmmov %vm4675_vm4 }
 0x2f2   : > { %v1275_v26 = vadd.f32 %v1267_v32, %v1215_v11  ;;  %v1271_v55 = vmul.f32 %v3639_v59, %v1253_v46  ;;  %v1270_v21 = vmul.f32 %v3639_v59, %v1252_v45  ;;  %v1237_v5 = vsel %vm4680_vm5, %v1230_v6, %v1234_v49  ;;  %vm4681_vm6 = vmmov %vm4675_vm4 }
 0x2f3   : > { %v1243_v41 = vsel %vm4681_vm6, %v1234_v49, %v3715_v37  ;;  %v1236_v11 = vpop.permute.xlu1 %1235  ;;  %v1250_v38 = vsel %vm2795_vm11, %v1237_v5, 0.0  ;;  %vm4686_vm4 = vcmp.lt.s32.totalorder %v2714_v31, 16 }
 0x2f4   : > { %v1279_v17 = vadd.f32 %v1271_v55, %v1219_v53  ;;  %v1247_v32 = vsel %vm2791_vm10, %v1243_v41, 0.0  ;;  %v1268_v45 = vmul.f32 %v3633_v22, %v1250_v38  ;;  %v1238_v6 = vsel %vm4684_vm13, %v3723_v60, %v1236_v11  ;;  %vm4687_vm5 = vmmov %vm4686_vm4 }
 0x2f5   : > { %v1265_v39 = vmul.f32 %v3633_v22, %v1247_v32  ;;  %v1244_v37 = vsel %vm4685_vm14, %v1236_v11, %v3717_v14  ;;  %v1286_v19 = vpop.permute.xlu0 %1285  ;;  %v1254_v53 = vsel %vm2795_vm11, %v1238_v6, 0.0  ;;  %v1274_v60 = vadd.f32 %v1266_v57, %v1214_v10  ;;  %v4688_v11 = vld [vmem:[#allocation32_spill] sm:$0xff]  ;;  %v4690_v32 = vld [vmem:[#allocation33_spill] sm:$0xff]  ;;  %vm4692_vm6 = vmmov %vm4686_vm4 }
 0x2f6   : > { %v1251_v55 = vsel %vm2791_vm10, %v1244_v37, 0.0  ;;  %v1299_v46 = vsel %vm4686_vm4, %v1286_v19, %v3740_v33  ;;  %v1301_v22 = vsel %vm4687_vm5, %v3729_v54, %v1286_v19  ;;  %v1278_v49 = vadd.f32 %v1270_v21, %v1218_v7  ;;  %vm4693_vm13 = vmmov %vm4686_vm4 }
 0x2f7   : > { %v1220_v14 = vmul.f32 %v3623_v44, %v3635_v36  ;;  %v1269_v5 = vmul.f32 %v3639_v59, %v1251_v55  ;;  %v1288_v41 = vpop.permute.xlu1 %1287  ;;  %vm4689_vm10 = vnez %v4688_v11  ;;  %vm4691_vm11 = vnez %v4690_v32  ;;  %vm4694_vm14 = vmmov %vm4686_vm4 }
 0x2f8   : > { %v1309_v63 = vsel %vm4689_vm10, %v1301_v22, 0.0  ;;  %v1310_v12 = vsel %vm4691_vm11, %v1299_v46, 0.0  ;;  %v1300_v38 = vsel %vm4692_vm6, %v1288_v41, %v3745_v30  ;;  %v1302_v10 = vsel %vm4693_vm13, %v3731_v23, %v1288_v41  ;;  %v4697_v22 = vld [vmem:[#allocation35_spill] sm:$0xff]  ;;  %vm4700_vm6 = vmmov %vm4686_vm4 }
 0x2f9   : > { %v1273_v57 = vadd.f32 %v1265_v39, %v1213_v1  ;;  %v1276_v21 = vadd.f32 %v1268_v45, %v1216_v48  ;;  %v1272_v44 = vmul.f32 %v3639_v59, %v1254_v53  ;;  %v1328_v36 = vmul.f32 %v3645_v13, %v1310_v12  ;;  %v1294_v7 = vpop.permute.xlu0 %1293  ;;  %v4695_v53 = vld [vmem:[#allocation34_spill] sm:$0xff] }
 0x2fa   : > { %v1313_v6 = vsel %vm4689_vm10, %v1302_v10, 0.0  ;;  %v1314_v37 = vsel %vm4691_vm11, %v1300_v38, 0.0  ;;  %v1297_v19 = vsel %vm4694_vm14, %v3740_v33, %v1294_v7  ;;  %v1303_v1 = vsel %vm4686_vm4, %v1294_v7, %v3729_v54  ;;  %vm4699_vm11 = vmmov %vm4686_vm4 }
 0x2fb   : > { %v1277_v48 = vadd.f32 %v1269_v5, %v1217_v15  ;;  %v1327_v59 = vmul.f32 %v3645_v13, %v1309_v63  ;;  %v1336_v39 = vadd.f32 %v1328_v36, %v1275_v26  ;;  %v1332_v45 = vmul.f32 %v3649_v3, %v1314_v37  ;;  %v1296_v55 = vpop.permute.xlu1 %1295  ;;  %v4703_v36 = vld [vmem:[#allocation37_spill] sm:$0xff] }
 0x2fc   : > { %vm4696_vm5 = vnez %v4695_v53  ;;  %vm4698_vm10 = vnez %v4697_v22  ;;  %v1298_v33 = vsel %vm4699_vm11, %v3745_v30, %v1296_v55  ;;  %v1304_v54 = vsel %vm4700_vm6, %v1296_v55, %v3731_v23 }
 0x2fd   : > { %v1308_v46 = vsel %vm4696_vm5, %v1303_v1, 0.0  ;;  %v1311_v41 = vsel %vm4698_vm10, %v1297_v19, 0.0  ;;  %v1280_v15 = vadd.f32 %v1272_v44, %v1220_v14  ;;  %v1331_v26 = vmul.f32 %v3649_v3, %v1313_v6  ;;  %v1347_v63 = vpop.permute.xlu0 %1346  ;;  %v4705_v6 = vld [vmem:[#allocation38_spill] sm:$0xff] }
 0x2fe   : > { %v1340_v5 = vadd.f32 %v1332_v45, %v1279_v17  ;;  %v1329_v11 = vmul.f32 %v3645_v13, %v1311_v41  ;;  %v1312_v32 = vsel %vm4696_vm5, %v1304_v54, 0.0  ;;  %v1315_v12 = vsel %vm4698_vm10, %v1298_v33, 0.0 }
 0x2ff   : > { %vm4701_vm13 = vcmp.lt.s32.totalorder %v2714_v31, 15  ;;  %v1335_v14 = vadd.f32 %v1327_v59, %v1274_v60  ;;  %v1326_v17 = vmul.f32 %v3645_v13, %v1308_v46  ;;  %v1333_v10 = vmul.f32 %v3649_v3, %v1315_v12  ;;  %v1349_v44 = vpop.permute.xlu1 %1348 }
 0x300   : > { %v1360_v30 = vsel %vm4701_vm13, %v1347_v63, %v3751_v9  ;;  %vm4702_vm14 = vmmov %vm4701_vm13  ;;  %v1337_v38 = vadd.f32 %v1329_v11, %v1276_v21  ;;  %vm4704_vm4 = vnez %v4703_v36  ;;  %vm4706_vm5 = vnez %v4705_v6  ;;  %v4713_v11 = vld [vmem:[#allocation40_spill] sm:$0xff] }
 0x301   : > { %v1362_v23 = vsel %vm4702_vm14, %v3747_v43, %v1347_v63  ;;  %v1371_v37 = vsel %vm4706_vm5, %v1360_v30, 0.0  ;;  %vm4707_vm10 = vmmov %vm4701_vm13  ;;  %v1339_v1 = vadd.f32 %v1331_v26, %v1278_v49  ;;  %v1330_v13 = vmul.f32 %v3649_v3, %v1312_v32  ;;  %v1355_v45 = vpop.permute.xlu0 %1354  ;;  %v4719_v6 = vld [vmem:[#allocation44_spill] sm:$0xff] }
 0x302   : > { %v1370_v7 = vsel %vm4704_vm4, %v1362_v23, 0.0  ;;  %v1361_v19 = vsel %vm4707_vm10, %v1349_v44, %v3753_v16  ;;  %vm4708_vm11 = vmmov %vm4707_vm10  ;;  %v1341_v21 = vadd.f32 %v1333_v10, %v1280_v15  ;;  %v1389_v59 = vmul.f32 %v3655_v61, %v1371_v37  ;;  %v4711_v15 = vld [vmem:[#allocation39_spill] sm:$0xff] }
 0x303   : > { %v1363_v60 = vsel %vm4708_vm11, %v3749_v34, %v1349_v44  ;;  %v1375_v53 = vsel %vm4706_vm5, %v1361_v19, 0.0  ;;  %vm4709_vm6 = vmmov %vm4707_vm10  ;;  %v1334_v22 = vadd.f32 %v1326_v17, %v1273_v57  ;;  %v1388_v3 = vmul.f32 %v3655_v61, %v1370_v7  ;;  %v1357_v54 = vpop.permute.xlu1 %1356 }
 0x304   : > { %v1374_v55 = vsel %vm4704_vm4, %v1363_v60, 0.0  ;;  %v1358_v46 = vsel %vm4709_vm6, %v3751_v9, %v1355_v45  ;;  %vm4710_vm13 = vmmov %vm4709_vm6  ;;  %v1397_v41 = vadd.f32 %v1389_v59, %v1336_v39  ;;  %v1393_v33 = vmul.f32 %v3659_v18, %v1375_v53 }
 0x305   : > { %v1364_v49 = vsel %vm4710_vm13, %v1355_v45, %v3747_v43  ;;  %vm4712_vm14 = vnez %v4711_v15  ;;  %vm4714_vm4 = vnez %v4713_v11  ;;  %vm4715_vm5 = vmmov %vm4709_vm6  ;;  %v1338_v57 = vadd.f32 %v1330_v13, %v1277_v48  ;;  %v1408_v30 = vpop.permute.xlu0 %1407 }
 0x306   : > { %v1369_v26 = vsel %vm4712_vm14, %v1364_v49, 0.0  ;;  %v1372_v63 = vsel %vm4714_vm4, %v1358_v46, 0.0  ;;  %v1359_v9 = vsel %vm4715_vm5, %v3753_v16, %v1357_v54  ;;  %vm4716_vm10 = vmmov %vm4715_vm5  ;;  %v1392_v39 = vmul.f32 %v3659_v18, %v1374_v55 }
 0x307   : > { %v1365_v43 = vsel %vm4716_vm10, %v1357_v54, %v3749_v34  ;;  %v1401_v32 = vadd.f32 %v1393_v33, %v1340_v5  ;;  %v1390_v12 = vmul.f32 %v3655_v61, %v1372_v63  ;;  %v1376_v17 = vsel %vm4714_vm4, %v1359_v9, 0.0  ;;  %v1410_v36 = vpop.permute.xlu1 %1409  ;;  %v4727_v54 = vld [vmem:[#allocation45_spill] sm:$0xff] }
 0x308   : > { %v1373_v23 = vsel %vm4712_vm14, %v1365_v43, 0.0  ;;  %vm4717_vm11 = vcmp.lt.s32.totalorder %v2714_v31, 1  ;;  %v1387_v48 = vmul.f32 %v3655_v61, %v1369_v26  ;;  %v1394_v44 = vmul.f32 %v3659_v18, %v1376_v17 }
 0x309   : > { %v1421_v16 = vsel %vm4717_vm11, %v1408_v30, %v3759_v8  ;;  %vm4718_vm6 = vmmov %vm4717_vm11  ;;  %v1398_v5 = vadd.f32 %v1390_v12, %v1337_v38  ;;  %v1391_v10 = vmul.f32 %v3659_v18, %v1373_v23  ;;  %v1396_v7 = vadd.f32 %v1388_v3, %v1335_v14  ;;  %v4723_v38 = vld [vmem:[#allocation41_spill] sm:$0xff]  ;;  %v1416_v45 = vpop.permute.xlu0 %1415 }
 0x30a   : > { %v1423_v34 = vsel %vm4718_vm6, %v3755_v35, %v1408_v30  ;;  %vm4720_vm13 = vnez %v4719_v6  ;;  %vm4721_vm14 = vmmov %vm4718_vm6  ;;  %v1400_v13 = vadd.f32 %v1392_v39, %v1339_v1  ;;  %v1402_v61 = vadd.f32 %v1394_v44, %v1341_v21 }
 0x30b   : > { %v1432_v37 = vsel %vm4720_vm13, %v1421_v16, 0.0  ;;  %v1422_v19 = vsel %vm4721_vm14, %v1410_v36, %v3761_v4  ;;  %vm4722_vm4 = vmmov %vm4718_vm6  ;;  %vm4724_vm5 = vnez %v4723_v38  ;;  %v1395_v21 = vadd.f32 %v1387_v48, %v1334_v22  ;;  %v1418_v33 = vpop.permute.xlu1 %1417 }
 0x30c   : > { %v1424_v60 = vsel %vm4722_vm4, %v3757_v20, %v1410_v36  ;;  %v1431_v59 = vsel %vm4724_vm5, %v1423_v34, 0.0  ;;  %v1450_v18 = vmul.f32 %v3665_v25, %v1432_v37  ;;  %v1436_v55 = vsel %vm4720_vm13, %v1422_v19, 0.0  ;;  %vm4725_vm10 = vmmov %vm4722_vm4 }
 0x30d   : > { %v1435_v14 = vsel %vm4724_vm5, %v1424_v60, 0.0  ;;  %v1419_v53 = vsel %vm4725_vm10, %v3759_v8, %v1416_v45  ;;  %vm4726_vm11 = vmmov %vm4722_vm4  ;;  %v1399_v46 = vadd.f32 %v1391_v10, %v1338_v57  ;;  %v1454_v3 = vmul.f32 %v3669_v58, %v1436_v55  ;;  %v1469_v9 = vpop.permute.xlu0 %1468 }
 0x30e   : > { %v1425_v1 = vsel %vm4726_vm11, %v1416_v45, %v3755_v35  ;;  %v1458_v49 = vadd.f32 %v1450_v18, %v1397_v41  ;;  %vm4728_vm6 = vnez %v4727_v54  ;;  %vm4729_vm14 = vnez %v4537_v51  ;;  %vm4730_vm13 = vmmov %vm4722_vm4 }
 0x30f   : > { %v1430_v15 = vsel %vm4728_vm6, %v1425_v1, 0.0  ;;  %v1433_v26 = vsel %vm4729_vm14, %v1419_v53, 0.0  ;;  %v1420_v8 = vsel %vm4730_vm13, %v3761_v4, %v1418_v33  ;;  %v1426_v35 = vsel %vm4722_vm4, %v1418_v33, %v3757_v20  ;;  %v1471_v23 = vpop.permute.xlu1 %1470 }
 0x310   : > { %v1449_v22 = vmul.f32 %v3665_v25, %v1431_v59  ;;  %v1453_v41 = vmul.f32 %v3669_v58, %v1435_v14  ;;  %v1462_v11 = vadd.f32 %v1454_v3, %v1401_v32  ;;  %v1451_v63 = vmul.f32 %v3665_v25, %v1433_v26 }
 0x311   : > { %v1434_v43 = vsel %vm4728_vm6, %v1426_v35, 0.0  ;;  %v1437_v57 = vsel %vm4729_vm14, %v1420_v8, 0.0  ;;  %vm4731_vm5 = vcmp.lt.s32.totalorder %v2714_v31, 127  ;;  %v1448_v39 = vmul.f32 %v3665_v25, %v1430_v15  ;;  %v1477_v10 = vpop.permute.xlu0 %1476  ;;  %v4748_v15 = vld [vmem:[#allocation15_spill] sm:$0xff]  ;;  %v4750_v8 = vld [vmem:[#allocation6_spill] sm:$0xff] }
 0x312   : > { %v1482_v4 = vsel %vm4731_vm5, %v1469_v9, %v3767_v50  ;;  %vm4732_vm10 = vmmov %vm4731_vm5  ;;  %v1459_v32 = vadd.f32 %v1451_v63, %v1398_v5  ;;  %v1452_v12 = vmul.f32 %v3669_v58, %v1434_v43  ;;  %v1455_v30 = vmul.f32 %v3669_v58, %v1437_v57 }
 0x313   : > { %v1484_v20 = vsel %vm4732_vm10, %v3763_v29, %v1469_v9  ;;  %vm4733_vm11 = vnez %v4550_v52  ;;  %vm4734_vm6 = vnez %v4560_v24  ;;  %vm4735_vm14 = vmmov %vm4731_vm5  ;;  %v1457_v34 = vadd.f32 %v1449_v22, %v1396_v7  ;;  %v1479_v38 = vpop.permute.xlu1 %1478  ;;  %v4752_v22 = vld [vmem:[#allocation24_spill] sm:$0xff] }
 0x314   : > { %v1491_v51 = vsel %vm4733_vm11, %v1484_v20, 0.0  ;;  %v1492_v17 = vsel %vm4734_vm6, %v1482_v4, 0.0  ;;  %v1483_v16 = vsel %vm4735_vm14, %v1471_v23, %v3769_v62  ;;  %vm4736_vm13 = vmmov %vm4731_vm5  ;;  %v1463_v48 = vadd.f32 %v1455_v30, %v1402_v61 }
 0x315   : > { %v1485_v25 = vsel %vm4736_vm13, %v3765_v2, %v1471_v23  ;;  %v1509_v5 = vmul.f32 %v3675_v40, %v1491_v51  ;;  %v1510_v58 = vmul.f32 %v3675_v40, %v1492_v17  ;;  %v1496_v36 = vsel %vm4734_vm6, %v1483_v16, 0.0  ;;  %vm4737_vm4 = vmmov %vm4731_vm5  ;;  %v1530_v14 = vpop.permute.xlu0 %1529  ;;  %v4756_v51 = vld [vmem:[#allocation13_spill] sm:$0xff]  ;;  %v4758_v16 = vld [vmem:[#allocation12_spill] sm:$0xff] }
 0x316   : > { %v1495_v44 = vsel %vm4733_vm11, %v1485_v25, 0.0  ;;  %v1480_v6 = vsel %vm4737_vm4, %v3767_v50, %v1477_v10  ;;  %vm4738_vm5 = vmmov %vm4737_vm4  ;;  %v1461_v37 = vadd.f32 %v1453_v41, %v1400_v13  ;;  %v1456_v19 = vadd.f32 %v1448_v39, %v1395_v21 }
 0x317   : > { %v1486_v7 = vsel %vm4738_vm5, %v1477_v10, %v3763_v29  ;;  %v1460_v60 = vadd.f32 %v1452_v12, %v1399_v46  ;;  %v1513_v61 = vmul.f32 %v3679_v42, %v1495_v44  ;;  %vm4739_vm10 = vnez %v4565_v0  ;;  %vm4741_vm6 = vmmov %vm4737_vm4  ;;  %v1532_v33 = vpop.permute.xlu1 %1531  ;;  %v4755_v12 = vld [vmem:[#allocation25_spill] sm:$0xff] }
 0x318   : > { %v1493_v52 = vsel %vm4739_vm10, %v1480_v6, 0.0  ;;  %vm4740_vm11 = vnez %v4568_v27  ;;  %v1481_v50 = vsel %vm4741_vm6, %v3769_v62, %v1479_v38  ;;  %vm4742_vm14 = vmmov %vm4737_vm4  ;;  %v1517_v13 = vadd.f32 %v1509_v5, %v1456_v19  ;;  %v4746_v27 = vld [vmem:[#allocation11_spill] sm:$0xff] }
 0x319   : > { %v1494_v24 = vsel %vm4740_vm11, %v1486_v7, 0.0  ;;  %v1487_v29 = vsel %vm4742_vm14, %v1479_v38, %v3765_v2  ;;  %v1518_v59 = vadd.f32 %v1510_v58, %v1457_v34  ;;  %v1514_v18 = vmul.f32 %v3679_v42, %v1496_v36  ;;  %v1538_v9 = vpop.permute.xlu0 %1537  ;;  %v4761_v36 = vld [vmem:[#allocation27_spill] sm:$0xff]  ;;  %v4763_v7 = vld [vmem:[#allocation16_spill] sm:$0xff] }
 0x31a   : > { %v1511_v45 = vmul.f32 %v3675_v40, %v1493_v52  ;;  %v1497_v55 = vsel %vm4739_vm10, %v1481_v50, 0.0  ;;  %v1498_v53 = vsel %vm4740_vm11, %v1487_v29, 0.0  ;;  %vm4743_vm13 = vcmp.lt.s32.totalorder %v2714_v31, 113 }
 0x31b   : > { %v1543_v62 = vsel %vm4743_vm13, %v1530_v14, %v3775_v56  ;;  %vm4744_vm4 = vmmov %vm4743_vm13  ;;  %v1521_v1 = vadd.f32 %v1513_v61, %v1460_v60  ;;  %v1512_v21 = vmul.f32 %v3675_v40, %v1494_v24  ;;  %v1515_v3 = vmul.f32 %v3679_v42, %v1497_v55  ;;  %v1540_v23 = vpop.permute.xlu1 %1539 }
 0x31c   : > { %v1545_v2 = vsel %vm4744_vm4, %v3771_v28, %v1530_v14  ;;  %v1519_v46 = vadd.f32 %v1511_v45, %v1458_v49  ;;  %vm4745_vm5 = vnez %v4574_v47  ;;  %vm4747_vm10 = vnez %v4746_v27  ;;  %vm4749_vm11 = vmmov %vm4744_vm4 }
 0x31d   : > { %v1552_v0 = vsel %vm4745_vm5, %v1545_v2, 0.0  ;;  %v1553_v54 = vsel %vm4747_vm10, %v1543_v62, 0.0  ;;  %v1544_v26 = vsel %vm4749_vm11, %v1532_v33, %v4748_v15  ;;  %vm4751_vm6 = vmmov %vm4744_vm4  ;;  %v1516_v40 = vmul.f32 %v3679_v42, %v1498_v53  ;;  %v1591_v58 = vpop.permute.xlu0 %1590  ;;  %v4771_v53 = vld [vmem:[#allocation7_spill] sm:$0xff] }
 0x31e   : > { %v1546_v35 = vsel %vm4751_vm6, %v4750_v8, %v1532_v33  ;;  %v1523_v49 = vadd.f32 %v1515_v3, %v1462_v11  ;;  %v1570_v41 = vmul.f32 %v4752_v22, %v1552_v0  ;;  %v1571_v63 = vmul.f32 %v4752_v22, %v1553_v54  ;;  %vm4753_vm14 = vmmov %vm4744_vm4 }
 0x31f   : > { %v1522_v43 = vadd.f32 %v1514_v18, %v1461_v37  ;;  %v1557_v57 = vsel %vm4747_vm10, %v1544_v26, 0.0  ;;  %v1541_v4 = vsel %vm4753_vm14, %v3775_v56, %v1538_v9  ;;  %vm4754_vm13 = vmmov %vm4744_vm4  ;;  %v1520_v39 = vadd.f32 %v1512_v21, %v1459_v32  ;;  %v1593_v38 = vpop.permute.xlu1 %1592  ;;  %v4769_v18 = vld [vmem:[#allocation36_spill] sm:$0xff] }
 0x320   : > { %v1547_v20 = vsel %vm4754_vm13, %v1538_v9, %v3771_v28  ;;  %v1579_v42 = vadd.f32 %v1571_v63, %v1518_v59  ;;  %v1556_v11 = vsel %vm4745_vm5, %v1546_v35, 0.0  ;;  %v1575_v30 = vmul.f32 %v4755_v12, %v1557_v57  ;;  %vm4760_vm11 = vmmov %vm4751_vm6  ;;  %v4774_v26 = vld [vmem:[#allocation8_spill] sm:$0xff] }
 0x321   : > { %vm4757_vm4 = vnez %v4756_v51  ;;  %vm4759_vm10 = vnez %v4758_v16  ;;  %v1542_v56 = vsel %vm4760_vm11, %v4748_v15, %v1540_v23  ;;  %v1548_v28 = vsel %vm4751_vm6, %v1540_v23, %v4750_v8  ;;  %v1599_v21 = vpop.permute.xlu0 %1598 }
 0x322   : > { %v1554_v17 = vsel %vm4757_vm4, %v1541_v4, 0.0  ;;  %v1555_v25 = vsel %vm4759_vm10, %v1547_v20, 0.0  ;;  %v1524_v32 = vadd.f32 %v1516_v40, %v1463_v48  ;;  %v1578_v47 = vadd.f32 %v1570_v41, %v1517_v13  ;;  %v4767_v13 = vld [vmem:[#allocation28_spill] sm:$0xff] }
 0x323   : > { %v1583_v34 = vadd.f32 %v1575_v30, %v1522_v43  ;;  %v1572_v5 = vmul.f32 %v4752_v22, %v1554_v17  ;;  %v1558_v10 = vsel %vm4757_vm4, %v1542_v56, 0.0  ;;  %v1559_v44 = vsel %vm4759_vm10, %v1548_v28, 0.0  ;;  %v1601_v35 = vpop.permute.xlu1 %1600  ;;  %v4781_v30 = vld [vmem:[#allocation42_spill] sm:$0xff] }
 0x324   : > { %vm4762_vm5 = vcmp.lt.s32.totalorder %v2714_v31, 112  ;;  %v1574_v48 = vmul.f32 %v4755_v12, %v1556_v11  ;;  %v1573_v19 = vmul.f32 %v4752_v22, %v1555_v25  ;;  %v1576_v61 = vmul.f32 %v4755_v12, %v1558_v10  ;;  %v4779_v11 = vld [vmem:[#allocation46_spill] sm:$0xff]  ;;  %v4787_v10 = vld [vmem:[#allocation43_spill] sm:$0xff] }
 0x325   : > { %v1604_v6 = vsel %vm4762_vm5, %v1591_v58, %v4761_v36  ;;  %vm4764_vm14 = vmmov %vm4762_vm5  ;;  %v1580_v60 = vadd.f32 %v1572_v5, %v1519_v46  ;;  %v1577_v14 = vmul.f32 %v4755_v12, %v1559_v44  ;;  %v1652_v20 = vpop.permute.xlu0 %1651  ;;  %vm4780_vm6 = vcmp.lt.s32.totalorder %v2714_v31, 111  ;;  %v4785_v5 = vld [vmem:[#allocation47_spill] sm:$0xff] }
 0x326   : > { %v1606_v37 = vsel %vm4764_vm14, %v4763_v7, %v1591_v58  ;;  %v1614_v29 = vsel %vm3370_vm12, %v1604_v6, 0.0  ;;  %vm4768_vm13 = vmmov %vm4762_vm5  ;;  %v1584_v55 = vadd.f32 %v1576_v61, %v1523_v49  ;;  %v1582_v27 = vadd.f32 %v1574_v48, %v1521_v1 }
 0x327   : > { %v1613_v24 = vsel %vm3353_vm1, %v1606_v37, 0.0  ;;  %v1605_v59 = vsel %vm4768_vm13, %v1593_v38, %v4767_v13  ;;  %vm4770_vm4 = vmmov %vm4762_vm5  ;;  %v1632_v2 = vmul.f32 %v4771_v53, %v1614_v29  ;;  %v1581_v54 = vadd.f32 %v1573_v19, %v1520_v39  ;;  %v1654_v56 = vpop.permute.xlu1 %1653  ;;  %v4792_v29 = vld [vmem:[#allocation10_spill] sm:$0xff] }
 0x328   : > { %v1607_v45 = vsel %vm4770_vm4, %v4769_v18, %v1593_v38  ;;  %v1631_v62 = vmul.f32 %v4771_v53, %v1613_v24  ;;  %v1618_v3 = vsel %vm3370_vm12, %v1605_v59, 0.0  ;;  %vm4772_vm10 = vmmov %vm4770_vm4  ;;  %v1585_v1 = vadd.f32 %v1577_v14, %v1524_v32 }
 0x329   : > { %v1617_v46 = vsel %vm3353_vm1, %v1607_v45, 0.0  ;;  %v1602_v33 = vsel %vm4772_vm10, %v4761_v36, %v1599_v21  ;;  %vm4773_vm11 = vmmov %vm4770_vm4  ;;  %v1640_v15 = vadd.f32 %v1632_v2, %v1579_v42  ;;  %v1636_v8 = vmul.f32 %v4774_v26, %v1618_v3  ;;  %v1660_v19 = vpop.permute.xlu0 %1659 }
 0x32a   : > { %v1608_v0 = vsel %vm4773_vm11, %v1599_v21, %v4763_v7  ;;  %v1615_v49 = vsel %vm3387_vm9, %v1602_v33, 0.0  ;;  %vm4777_vm12 = vmmov %vm4770_vm4  ;;  %v1635_v43 = vmul.f32 %v4774_v26, %v1617_v46  ;;  %v1639_v39 = vadd.f32 %v1631_v62, %v1578_v47  ;;  %v4789_v7 = vld [vmem:[#allocation9_spill] sm:$0xff] }
 0x32b   : > { %v1616_v41 = vsel %vm3394_vm0, %v1608_v0, 0.0  ;;  %v1603_v63 = vsel %vm4777_vm12, %v4767_v13, %v1601_v35  ;;  %vm4778_vm1 = vmmov %vm4770_vm4  ;;  %v1644_v57 = vadd.f32 %v1636_v8, %v1583_v34  ;;  %v1633_v4 = vmul.f32 %v4771_v53, %v1615_v49 }
 0x32c   : > { %v1609_v9 = vsel %vm4778_vm1, %v1601_v35, %v4769_v18  ;;  %v1619_v42 = vsel %vm3387_vm9, %v1603_v63, 0.0  ;;  %v1665_v12 = vsel %vm4780_vm6, %v1652_v20, %v4779_v11  ;;  %vm4782_vm5 = vmmov %vm4780_vm6  ;;  %v1634_v51 = vmul.f32 %v4771_v53, %v1616_v41  ;;  %v1662_v18 = vpop.permute.xlu1 %1661 }
 0x32d   : > { %v1667_v23 = vsel %vm4782_vm5, %v4781_v30, %v1652_v20  ;;  %v1641_v17 = vadd.f32 %v1633_v4, %v1580_v60  ;;  %v1620_v16 = vsel %vm3394_vm0, %v1609_v9, 0.0  ;;  %v1637_v25 = vmul.f32 %v4774_v26, %v1619_v42  ;;  %vm4786_vm9 = vmmov %vm4782_vm5 }
 0x32e   : > { %v1674_v32 = vsel %vm3416_vm15, %v1667_v23, 0.0  ;;  %v1675_v34 = vsel %vm3442_vm2, %v1665_v12, 0.0  ;;  %v1666_v58 = vsel %vm4786_vm9, %v1654_v56, %v4785_v5  ;;  %vm4788_vm14 = vmmov %vm4782_vm5  ;;  %v1643_v36 = vadd.f32 %v1635_v43, %v1582_v27 }
 0x32f   : > { %v1668_v44 = vsel %vm4788_vm14, %v4787_v10, %v1654_v56  ;;  %v1645_v6 = vadd.f32 %v1637_v25, %v1584_v55  ;;  %v1692_v37 = vmul.f32 %v4789_v7, %v1674_v32  ;;  %v1693_v48 = vmul.f32 %v4789_v7, %v1675_v34  ;;  %vm4790_vm0 = vmmov %vm4782_vm5 }
 0x330   : > { %v1678_v60 = vsel %vm3416_vm15, %v1668_v44, 0.0  ;;  %v1679_v61 = vsel %vm3442_vm2, %v1666_v58, 0.0  ;;  %v1663_v38 = vsel %vm4790_vm0, %v4779_v11, %v1660_v19  ;;  %vm4791_vm13 = vmmov %vm4790_vm0  ;;  %v1642_v24 = vadd.f32 %v1634_v51, %v1581_v54 }
 0x331   : > { %v1669_v52 = vsel %vm4791_vm13, %v1660_v19, %v4781_v30  ;;  %v1638_v50 = vmul.f32 %v4774_v26, %v1620_v16  ;;  %v1696_v13 = vmul.f32 %v4792_v29, %v1678_v60  ;;  %v1697_v59 = vmul.f32 %v4792_v29, %v1679_v61  ;;  %vm4795_vm15 = vmmov %vm4790_vm0 }
 0x332   : > { %v1676_v14 = vsel %vm3473_vm7, %v1663_v38, 0.0  ;;  %v1677_v53 = vsel %vm3480_vm8, %v1669_v52, 0.0  ;;  %v1664_v62 = vsel %vm4795_vm15, %v4785_v5, %v1662_v18  ;;  %vm4796_vm2 = vmmov %vm4790_vm0  ;;  %v1700_v0 = vadd.f32 %v1692_v37, %v1639_v39  ;;  %v2146_v38 = vld [vmem:[%s4286_s8] sm:$0xff]  }
 0x333   : > { %v1670_v2 = vsel %vm4796_vm2, %v1662_v18, %v4787_v10  ;;  %v1704_v21 = vadd.f32 %v1696_v13, %v1643_v36  ;;  %v1705_v46 = vadd.f32 %v1697_v59, %v1644_v57  ;;  %v1694_v3 = vmul.f32 %v4789_v7, %v1676_v14  ;;  %v2147_v18 = vld [vmem:[%s2372_s22] sm:$0xff] }
 0x334   : > { %v1695_v33 = vmul.f32 %v4789_v7, %v1677_v53  ;;  %v1701_v27 = vadd.f32 %v1693_v48, %v1640_v15  ;;  %v1680_v54 = vsel %vm3473_vm7, %v1664_v62, 0.0  ;;  %v1681_v26 = vsel %vm3480_vm8, %v1670_v2, 0.0  ;;  %v2145_v15 = vld [vmem:[%s4284_s6] sm:$0xff]   ;;  %v2148_v2 = vld [vmem:[%s2372_s22 + $0x8] sm:$0xff] }
 0x335   : > { %v1646_v8 = vadd.f32 %v1638_v50, %v1585_v1  ;;  %v1702_v35 = vadd.f32 %v1694_v3, %v1641_v17  ;;  %v1698_v40 = vmul.f32 %v4792_v29, %v1680_v54  ;;  %v1699_v31 = vmul.f32 %v4792_v29, %v1681_v26  ;;  %v2150_v26 = vld [vmem:[%s2372_s22 + $0x10] sm:$0xff] }
 0x336   : > { %v1711_v49 = vpack.c.bf16 %v1705_v46, %v1701_v27  ;;  %v1710_v22 = vpack.c.bf16 %v1704_v21, %v1700_v0  ;;  %v1703_v41 = vadd.f32 %v1695_v33, %v1642_v24  ;;  %v4797_v1 = vmov 0   ;;  %v2149_v0 = vld [vmem:[%s2372_s22 + $0x20] sm:$0xff] }
 0x337   : > { %v1706_v63 = vadd.f32 %v1698_v40, %v1645_v6  ;;  %v1707_v9 = vadd.f32 %v1699_v31, %v1646_v8  ;;  %v2151_v40 = vld [vmem:[%s2372_s22 + $0x28] sm:$0xff] }
 0x338   : > { %1734 = vmatprep.subr.bf16.mxu0 %v1711_v49 }
 0x339   : > { %1735 = vmatpush1.bf16.msra.mxu0 %v1710_v22  ;;  %v1713_v43 = vpack.c.bf16 %v1707_v9, %v1703_v41  ;;  %v1712_v57 = vpack.c.bf16 %v1706_v63, %v1702_v35  ;;  %v2152_v22 = vld [vmem:[%s2372_s22 + $0x18] sm:$0xff]  ;;  %v2153_v9 = vld [vmem:[%s2372_s22 + $0x30] sm:$0xff] }
 0x33a   : > { %v1719_v4 = vpop.permute.xlu0 %1718 }
 0x33b   : > { %1777 = vmatprep.subr.bf16.mxu1 %v1713_v43  ;;  %v2154_v43 = vld [vmem:[%s2372_s22 + $0x38] sm:$0xff] }
 0x33c   : > { %2079 = vmatmul.mubr.msk.bf16.vlgmr.msra.gmra.mrb[4].mxu0 %vm1102_vm3, %v2145_v15  ;;  %1778 = vmatpush1.bf16.msra.mxu1 %v1712_v57  ;;  %v1724_v11 = vpop.permute.xlu1 %1723 }
 0x33d   : > { %1874 = vmatprep.mubr.bf16.mxu0 %v4797_v1 }
 0x33f   : > { %2080 = vmatmul.mubr.msk.bf16.vlgmr.msra.gmra.mrb[4].mxu1 %vm1102_vm3, %v2145_v15 }
 0x340   : > { %1917 = vmatprep.mubr.bf16.mxu1 %v4797_v1 }
 0x40f   : > { %v1768_v20 = vpop.f32.mrb[4].mxu0 }
 0x410   : > { %v1769_v39 = vadd.f32 %v1768_v20, %v1719_v4  ;;  %v1770_v42 = vpop.f32.mrb[5].mxu0 }
 0x411   : > { %v1771_v12 = vadd.f32 %v1770_v42, %v1719_v4  ;;  %v1772_v30 = vpop.f32.mrb[6].mxu0 }
 0x412   : > { %v1773_v23 = vadd.f32 %v1772_v30, %v1724_v11  ;;  %v1774_v51 = vpop.f32.mrb[7].mxu0  ;;  %v1811_v17 = vpop.f32.mrb[4].mxu1  ;;  %v1820_v28 = vmax.f32 %v1769_v39, 0.0 }
 0x413   : > { %v1775_v16 = vadd.f32 %v1774_v51, %v1724_v11  ;;  %v1812_v25 = vadd.f32 %v1811_v17, %v1719_v4  ;;  %v1813_v56 = vpop.f32.mrb[5].mxu1  ;;  %v1821_v5 = vmax.f32 %v1771_v12, 0.0 }
 0x414   : > { %v1824_v32 = vmax.f32 %v1773_v23, 0.0  ;;  %v1814_v47 = vadd.f32 %v1813_v56, %v1719_v4  ;;  %v1815_v34 = vpop.f32.mrb[6].mxu1 }
 0x415   : > { %v1825_v58 = vmax.f32 %v1775_v16, 0.0  ;;  %v1816_v10 = vadd.f32 %v1815_v34, %v1724_v11  ;;  %v1817_v44 = vpop.f32.mrb[7].mxu1  ;;  %v1822_v37 = vmax.f32 %v1812_v25, 0.0 }
 0x416   : > { %v1830_v36 = vpack.c.bf16 %v1824_v32, %v1820_v28  ;;  %v1818_v6 = vadd.f32 %v1817_v44, %v1724_v11  ;;  %v1823_v19 = vmax.f32 %v1814_v47, 0.0 }
 0x417   : > { %v1831_v7 = vpack.c.bf16 %v1825_v58, %v1821_v5  ;;  %v1826_v48 = vmax.f32 %v1816_v10, 0.0 }
 0x418   : > { %v1827_v60 = vmax.f32 %v1818_v6, 0.0 }
 0x419   : > { %v1832_v61 = vpack.c.bf16 %v1826_v48, %v1822_v37  ;;  %1842 = vmatprep.subr.bf16.mxu0 %v1831_v7 }
 0x41a   : > { %v1833_v52 = vpack.c.bf16 %v1827_v60, %v1823_v19  ;;  %1843 = vmatpush1.bf16.msra.mxu0 %v1830_v36 }
 0x41c   : > { %1885 = vmatprep.subr.bf16.mxu1 %v1833_v52 }
 0x41d   : > { %1886 = vmatpush1.bf16.msra.mxu1 %v1832_v61  ;;  %2082 = vmatmul.mubr.msk.bf16.vlgmr.msra.gmra.mrb[8].mxu0 %vm1102_vm3, %v2146_v38 }
 0x420   : > { %2083 = vmatmul.mubr.msk.bf16.vlgmr.msra.gmra.mrb[8].mxu1 %vm1102_vm3, %v2146_v38 }
 0x4f0   : > { %v1876_v24 = vpop.f32.mrb[8].mxu0 }
 0x4f1   : > { %v1928_v50 = vmax.f32 %v1876_v24, 0.0  ;;  %v1878_v29 = vpop.f32.mrb[9].mxu0 }
 0x4f2   : > { %v1929_v13 = vmax.f32 %v1878_v29, 0.0  ;;  %v1880_v59 = vpop.f32.mrb[10].mxu0 }
 0x4f3   : > { %v1936_v45 = vadd.f32 %v2147_v18, %v1928_v50  ;;  %v1919_v14 = vpop.f32.mrb[8].mxu1  ;;  %v1932_v55 = vmax.f32 %v1880_v59, 0.0  ;;  %v1882_v53 = vpop.f32.mrb[11].mxu0 }
 0x4f4   : > { %v1930_v62 = vmax.f32 %v1919_v14, 0.0  ;;  %v1937_v21 = vadd.f32 %v2148_v2, %v1929_v13  ;;  %v1921_v46 = vpop.f32.mrb[9].mxu1  ;;  %v1933_v3 = vmax.f32 %v1882_v53, 0.0 }
 0x4f5   : > { %1944 = vst [vmem:[%s4207_s17] sm:$0xff] %v1936_v45  ;;  %v1931_v33 = vmax.f32 %v1921_v46, 0.0  ;;  %v1940_v27 = vadd.f32 %v2149_v0, %v1932_v55  ;;  %v1923_v54 = vpop.f32.mrb[10].mxu1 }
 0x4f6   : > { %v1938_v8 = vadd.f32 %v2150_v26, %v1930_v62  ;;  %1945 = vst [vmem:[%s4207_s17 + $0x8] sm:$0xff] %v1937_v21  ;;  %v1934_v35 = vmax.f32 %v1923_v54, 0.0  ;;  %v1941_v31 = vadd.f32 %v2151_v40, %v1933_v3  ;;  %v1925_v49 = vpop.f32.mrb[11].mxu1 }
 0x4f7   : > { %v1939_v41 = vadd.f32 %v2152_v22, %v1931_v33  ;;  %1948 = vst [vmem:[%s4207_s17 + $0x20] sm:$0xff] %v1940_v27  ;;  %v1935_v63 = vmax.f32 %v1925_v49, 0.0 }
 0x4f8   : > { %1946 = vst [vmem:[%s4207_s17 + $0x10] sm:$0xff] %v1938_v8  ;;  %v1942_v15 = vadd.f32 %v2153_v9, %v1934_v35  ;;  %1949 = vst [vmem:[%s4207_s17 + $0x28] sm:$0xff] %v1941_v31 }
 0x4f9   : > { %1947 = vst [vmem:[%s4207_s17 + $0x18] sm:$0xff] %v1939_v41  ;;  %v1943_v57 = vadd.f32 %v2154_v43, %v1935_v63 }
 0x4fa   : > { %1950 = vst [vmem:[%s4207_s17 + $0x30] sm:$0xff] %v1942_v15 }
 0x4fb   : > { %1951 = vst [vmem:[%s4207_s17 + $0x38] sm:$0xff] %v1943_v57 }
 0x4fc   : > { %2168 = shalt.err (!%p2165_p5)
}
 0x4fd   : > { %s2169_s22 = scalar_lea.hbm %s4228_s26, 1024  ;;  %s2173_s23 = scalar_lea.hbm %s4287_s9, 2048 }
 0x4fe   : > { %p2170_p7 = scmp.ne.s32.totalorder %s4228_s26, %s2169_s22  ;;  %p2174_p12 = scmp.lt.u32.totalorder %s4228_s26, %s4287_s9 }
 0x4ff   : > { %p2175_p13 = scmp.lt.u32.totalorder %s2173_s23, %s2169_s22  ;;  %p2177_p1 = scmp.lt.u32.totalorder %s2169_s22, %s4228_s26 }
 0x500   : > { %p2171_p10 = pnand %p2170_p7, %p2320_p6 }
 0x501   : > { %p2176_p0 = por %p2175_p13, %p2174_p12 }
 0x502   : > { %p2172_p11 = pneg %p2171_p10 }
 0x503   : > { %p2178_p2 = por %p2177_p1, %p2176_p0 }
 0x505   : > { %p2179_p3 = pnand %p2178_p2, %p2172_p11 }
 0x507   : > { %2182 = shalt.err (!%p2179_p3)
}
 0x508   : > { %s2229_s16 = smov 512   ;;  %s2230_s24 = smov 1024  }
 0x509   : > { %s2231_s21 = smov 32  }
 0x50a   : > { %2091 = dma.vmem_to_hbm [thread:$0]  (%p2320_p6), %s4218_s27, 1024, %s4228_s26, %s4236_s28, %s2229_s16, %s2230_s24, %s2231_s21  }
 0x50b PF: > { %s1981_s29 = sand.u32 1, %s2205_s30   ;;  %p2094_p4 = pnand %p2036_p9, %p2324_p8 }
 0x50c   : > { %s1982_s22 = scalar_lea.sflag [#allocation4], %s1981_s29 }
 0x50d   : > { %2200 = dma.done.wait (!%p2094_p4), %s1982_s22, 1024  }
 0x50e   : > { %2202 = vsyncadd (!%p2094_p4), %s1982_s22, 4294966272  ;;  %p19_p5 = scmp.ge.s32.totalorder %s2305_s15, 4   ;;  %s4800_s30 = smov %s2209_s10 }
 0x50f   : > { %s4801_s10 = smov %s2213_s11  ;;  %s4802_s11 = smov %s2318_s18 }
 0x510   : > { %s4803_s12 = smov %s2305_s15  ;;  %21 = sbr.rel (!%p19_p5) target bundleno = 3 (0x3), region = 135 }
 0x517   :  { %1987 = vsyncpa [#allocation4], 1 }
 0x518   :  { %1989 = vsyncpa [#allocation4 + $0x1], 1 }

</bundles_post_ra>
